<compile_context>
chip_gen: v7x
topology: tpu7x:2x2x1
jax: 0.10.0
libtpu: 0.0.40
codegen_flags: <defaults>
</compile_context>

<pallas_src>
import math

import jax
import jax.numpy as jnp
from jax.experimental import pallas as pl
from jax.experimental.pallas import tpu as pltpu


# Rows of the packed [8, H] f32 parameter slab.
_ROW_CONV_B, _ROW_LN_G, _ROW_LN_B, _ROW_BQ, _ROW_QUERY, _ROW_SMAX = range(6)


def _encoder_tail(y, params_ref, wq_t_ref, sel_ref, emb_out_ref, repr_out_ref):
    """Shared tail: conv bias + LayerNorm + ReLU + query projection + attention.

    y: [M, H] f32 conv output (pre-bias) for TB sequences of length L = M // TB.
    """
    H = repr_out_ref.shape[1]
    conv_b = params_ref[_ROW_CONV_B:_ROW_CONV_B + 1, :]
    ln_g = params_ref[_ROW_LN_G:_ROW_LN_G + 1, :]
    ln_b = params_ref[_ROW_LN_B:_ROW_LN_B + 1, :]
    bq = params_ref[_ROW_BQ:_ROW_BQ + 1, :]
    query = params_ref[_ROW_QUERY:_ROW_QUERY + 1, :]
    smax = params_ref[_ROW_SMAX:_ROW_SMAX + 1, 0:1]            # [1, 1] scalar bound

    # ---- LayerNorm over H (eps = 1e-5, PyTorch default) + ReLU, in f32 ----
    y = y + conv_b
    mean = jnp.mean(y, axis=-1, keepdims=True)
    var = jnp.mean((y - mean) * (y - mean), axis=-1, keepdims=True)
    emb = jnp.maximum(
        (y - mean) * jax.lax.rsqrt(var + 1e-5) * ln_g + ln_b, 0.0)      # [M, H] f32

    # ---- key = tanh(wordQueryProject(emb)); bf16 MXU operands, f32 accumulate ----
    key = jnp.tanh(
        jnp.dot(emb.astype(jnp.bfloat16), wq_t_ref[...],
                preferred_element_type=jnp.float32) + bq)               # [M, H] f32

    # ---- personalized scaled-dot attention, batched over TB sequences ----
    # Per-token score is a lane reduce.  |key| <= 1 (tanh) so scores are bounded
    # by ||query||_1 / sqrt(H); subtracting that wrapper-computed bound (instead
    # of an M-deep cross-vreg max) keeps exp() <= 1 while leaving each
    # per-sequence softmax exact (invariant to a constant shift).  The clamp is
    # only an underflow guard; it never triggers unless ||query||_1/sqrt(H) > 30.
    t = jnp.sum(key * query, axis=-1, keepdims=True) * (1.0 / math.sqrt(H)) - smax
    u = jnp.exp(jnp.maximum(t, -60.0))                                  # [M, 1]

    # Per-sequence numerator AND denominator in one MXU contraction against the
    # resident 0/1 sequence-indicator matrix (no separate degenerate N=1 matmul).
    cat = jnp.concatenate([u * emb, u], axis=-1)                        # [M, H+1]
    r = jnp.dot(sel_ref[...], cat, preferred_element_type=jnp.float32)  # [TB, H+1]

    # TODO(synk): lane-dense emb store (pack 4 tokens per 128-lane row) would
    #             remove the 32-of-128 masked vst path; needs an in-kernel
    #             [M, H] -> [M/4, 4H] relayout.
    emb_out_ref[...] = emb.astype(emb_out_ref.dtype)
    repr_out_ref[...] = r[:, :H] / r[:, H:]


def cnn_encoder_kernel_fused(ids_ref, tproj_ref, params_ref, wq_t_ref, sel_ref,
                             emb_out_ref, repr_out_ref):
    """Fused-gather path: conv input rebuilt from token ids via a one-hot MXU matmul.

    ids_ref:   [M, 1]      int32 token ids (TB sequences of length L, row-major)
    tproj_ref: [3 * Vp, H] bf16; row (k*Vp + v) = embedding[v] @ conv_w[k]
                                 (rows >= vocab within each tap block are zero)
    """
    M = ids_ref.shape[0]
    TB = repr_out_ref.shape[0]
    L = M // TB
    Vp = tproj_ref.shape[0] // 3

    ids = ids_ref[...]                                                  # [M, 1] int32
    row = jax.lax.broadcasted_iota(jnp.int32, (M, 1), 0)
    pad_id = jnp.int32(Vp - 1)          # points at a zero row of every tap block
    # Conv1d(k=3, padding=1): out[l] = w0 @ x[l-1] + w1 @ x[l] + w2 @ x[l+1].
    # Shift the int32 id column (not f32 results); per-sequence edges point at the
    # zero table row, i.e. the conv zero padding.
    ids_prev = jnp.where(row % L == 0, pad_id, jnp.roll(ids, 1, axis=0))
    ids_next = jnp.where(row % L == L - 1, pad_id, jnp.roll(ids, -1, axis=0))

    lane = jax.lax.broadcasted_iota(jnp.int32, (M, Vp), 1)
    onehot = jnp.concatenate(
        [jnp.where(ids_prev == lane, 1.0, 0.0).astype(jnp.bfloat16),
         jnp.where(ids == lane, 1.0, 0.0).astype(jnp.bfloat16),
         jnp.where(ids_next == lane, 1.0, 0.0).astype(jnp.bfloat16)],
        axis=-1)                                                        # [M, 3*Vp]

    # One MXU push = gather + all three conv taps (each row sums exactly three
    # projected-table rows, so the f32 accumulation is essentially exact).
    y = jnp.dot(onehot, tproj_ref[...], preferred_element_type=jnp.float32)
    _encoder_tail(y, params_ref, wq_t_ref, sel_ref, emb_out_ref, repr_out_ref)


def cnn_encoder_kernel_gathered(x_ref, wcat_ref, params_ref, wq_t_ref, sel_ref,
                                emb_out_ref, repr_out_ref):
    """Large-vocab fallback: XLA gathers the embeddings; conv taps fused along K.

    x_ref:    [M, D]     bf16 token embeddings
    wcat_ref: [3 * D, H] bf16 conv taps stacked along K ([w0; w1; w2])
    """
    M = x_ref.shape[0]
    TB = repr_out_ref.shape[0]
    L = M // TB

    x = x_ref[...]                                                      # [M, D] bf16
    row = jax.lax.broadcasted_iota(jnp.int32, (M, 1), 0)
    zero = jnp.zeros_like(x)
    x_prev = jnp.where(row % L == 0, zero, jnp.roll(x, 1, axis=0))
    x_next = jnp.where(row % L == L - 1, zero, jnp.roll(x, -1, axis=0))
    x_cat = jnp.concatenate([x_prev, x, x_next], axis=-1)               # [M, 3*D]

    y = jnp.dot(x_cat, wcat_ref[...], preferred_element_type=jnp.float32)
    _encoder_tail(y, params_ref, wq_t_ref, sel_ref, emb_out_ref, repr_out_ref)


def _pick_block_seqs(bn, L, target_rows, max_rows):
    """Sequences per grid step: a multiple of 8 (sublanes), sized for ~target_rows
    token rows per MXU matmul, capped for v7x VMEM, and shrunk so the grid has
    >= 2 (preferably an even number of) steps for v7x megacore sharding."""
    rows = max(8 * L, min(target_rows, max_rows))
    tb = max(8, (rows // L) // 8 * 8)
    tb = min(tb, -(-bn // 8) * 8)                 # no point exceeding padded batch
    # Prefer >= 2 grid steps so both v7x TensorCores get work.
    while tb > 8 and -(-bn // tb) < 2:
        tb -= 8
    # Best effort: make the step count even without shrinking tb below half.
    if -(-bn // tb) >= 2:
        t = tb
        while t > max(8, tb // 2) and (-(-bn // t)) % 2 == 1:
            t -= 8
        if (-(-bn // t)) % 2 == 0:
            tb = t
    return tb


def cnn_encoder_forward(news_batch, params, *, target_rows=1024,
                        max_block_rows=2048, fused_gather_max_vocab=4096,
                        emb_out_dtype=jnp.float32):
    """news_batch: int32 [B, N, L].  Returns ([B, N, L, 1, H], [B, N, H])."""
    B, N, L = news_batch.shape
    emb_table = params["embedding"]
    V, D = emb_table.shape
    H = params["conv_b"].shape[-1]
    BN = B * N

    TB = _pick_block_seqs(BN, L, target_rows, max_block_rows)
    G = -(-BN // TB)                    # grid steps
    BN_pad = G * TB
    M = TB * L                          # token rows per grid step

    conv_w = params["conv_w"]                              # [3, D, H] f32
    wq_t = params["wq_t"].astype(jnp.bfloat16)

    # Packed [8, H] f32 parameter slab (one resident VMEM buffer instead of five).
    smax = jnp.sum(jnp.abs(params["query"])) * (1.0 / math.sqrt(H))
    param_slab = jnp.zeros((8, H), jnp.float32)
    param_slab = param_slab.at[_ROW_CONV_B].set(params["conv_b"][0])
    param_slab = param_slab.at[_ROW_LN_G].set(params["ln_g"][0])
    param_slab = param_slab.at[_ROW_LN_B].set(params["ln_b"][0])
    param_slab = param_slab.at[_ROW_BQ].set(params["bq"][0])
    param_slab = param_slab.at[_ROW_QUERY].set(params["query"][0])
    param_slab = param_slab.at[_ROW_SMAX].set(jnp.full((H,), smax, jnp.float32))

    # Block-diagonal per-sequence 0/1 indicator for the segmented attention sums,
    # hoisted out of the kernel (constant index_map -> fetched once, stays resident).
    sel = (jax.lax.broadcasted_iota(jnp.int32, (TB, M), 1) // L ==
           jax.lax.broadcasted_iota(jnp.int32, (TB, M), 0)).astype(jnp.float32)

    const = lambda shape: pl.BlockSpec(shape, lambda i: (0,) * len(shape))
    out_shapes = (jax.ShapeDtypeStruct((BN_pad * L, H), emb_out_dtype),
                  jax.ShapeDtypeStruct((BN_pad, H), jnp.float32))
    out_specs = [pl.BlockSpec((M, H), lambda i: (i, 0)),
                 pl.BlockSpec((TB, H), lambda i: (i, 0))]
    compiler_params = pltpu.CompilerParams(
        dimension_semantics=("parallel",),
        vmem_limit_bytes=64 * 1024 * 1024)   # headroom above the scoped default

    if V <= fused_gather_max_vocab:
        # Fused embedding gather: the kernel reads only int32 ids; the table is
        # pre-multiplied by each conv tap ([3*Vp, H], zero-padded rows) and DMA'd
        # to VMEM once.  Removes the [BN*L, D] activation HBM round-trip.
        Vp = ((V + 1 + 127) // 128) * 128            # >= V+1, lane aligned
        proj = jnp.einsum("vd,kdh->kvh", emb_table, conv_w,
                          precision=jax.lax.Precision.HIGHEST)          # [3, V, H]
        tproj = jnp.zeros((3, Vp, H), jnp.float32).at[:, :V, :].set(proj)
        tproj = tproj.reshape(3 * Vp, H).astype(jnp.bfloat16)

        ids = news_batch.reshape(BN * L, 1).astype(jnp.int32)
        if BN_pad != BN:
            ids = jnp.pad(ids, ((0, (BN_pad - BN) * L), (0, 0)))

        emb_out, repr_out = pl.pallas_call(
            cnn_encoder_kernel_fused,
            out_shape=out_shapes,
            grid_spec=pltpu.PrefetchScalarGridSpec(
                num_scalar_prefetch=0,
                grid=(G,),
                in_specs=[
                    pl.BlockSpec((M, 1), lambda i: (i, 0)),   # token ids
                    const((3 * Vp, H)),                       # projected table (resident)
                    const((8, H)),                            # param slab (resident)
                    const((H, H)),                            # Wq^T (resident)
                    const((TB, M)),                           # sequence indicator (resident)
                ],
                out_specs=out_specs),
            compiler_params=compiler_params,
        )(ids, tproj, param_slab, wq_t, sel)
    else:
        # TODO(synk): for very large vocab, scalar-prefetch the ids and DMA-gather
        #             table rows in-kernel; this fallback keeps the gather in XLA
        #             (one [BN*L, D] bf16 activation HBM round-trip).
        x = emb_table[news_batch].reshape(BN * L, D).astype(jnp.bfloat16)
        if BN_pad != BN:
            x = jnp.pad(x, ((0, (BN_pad - BN) * L), (0, 0)))
        wcat = conv_w.reshape(3 * D, H).astype(jnp.bfloat16)

        emb_out, repr_out = pl.pallas_call(
            cnn_encoder_kernel_gathered,
            out_shape=out_shapes,
            grid_spec=pltpu.PrefetchScalarGridSpec(
                num_scalar_prefetch=0,
                grid=(G,),
                in_specs=[
                    pl.BlockSpec((M, D), lambda i: (i, 0)),   # token embeddings
                    const((3 * D, H)),                        # conv taps, K-stacked
                    const((8, H)),
                    const((H, H)),
                    const((TB, M)),
                ],
                out_specs=out_specs),
            compiler_params=compiler_params,
        )(x, wcat, param_slab, wq_t, sel)

    news_embedding = emb_out.reshape(BN_pad, L, H)[:BN].reshape(B, N, L, 1, H)
    news_repr = repr_out[:BN].reshape(B, N, H)
    return news_embedding, news_repr


def reference_forward(news_batch, params):
    """Pure-JAX float32 reference mirroring the PyTorch forward (eval mode)."""
    with jax.default_matmul_precision("highest"):
        B, N, L = news_batch.shape
        H = params["conv_b"].shape[-1]
        x = params["embedding"][news_batch].reshape(B * N, L, -1)
        x_pad = jnp.pad(x, ((0, 0), (1, 1), (0, 0)))
        w = params["conv_w"]
        dot = lambda a, b: jnp.einsum("bld,dh->blh", a, b)
        y = (dot(x_pad[:, 0:L], w[0]) + dot(x_pad[:, 1:L + 1], w[1])
             + dot(x_pad[:, 2:L + 2], w[2]) + params["conv_b"])
        mean = jnp.mean(y, -1, keepdims=True)
        var = jnp.mean((y - mean) ** 2, -1, keepdims=True)
        emb = jnp.maximum(
            (y - mean) * jax.lax.rsqrt(var + 1e-5) * params["ln_g"] + params["ln_b"],
            0.0)                                                      # [BN, L, H]
        key = jnp.tanh(jnp.einsum("blh,hk->blk", emb, params["wq_t"]) + params["bq"])
        s = jnp.einsum("blh,h->bl", key, params["query"][0]) / math.sqrt(H)
        p = jax.nn.softmax(s, axis=-1)
        rep = jnp.einsum("bl,blh->bh", p, emb)
        return emb.reshape(B, N, L, 1, H), rep.reshape(B, N, H)


def make_params(key, vocab_size, embedding_dim, hidden_dim):
    ks = jax.random.split(key, 8)
    return {
        "embedding": jax.random.normal(ks[0], (vocab_size, embedding_dim), jnp.float32) * 0.1,
        "conv_w":    jax.random.normal(ks[1], (3, embedding_dim, hidden_dim), jnp.float32) * 0.1,
        "conv_b":    jax.random.normal(ks[2], (1, hidden_dim), jnp.float32) * 0.1,
        "ln_g":      jnp.ones((1, hidden_dim), jnp.float32),
        "ln_b":      jnp.zeros((1, hidden_dim), jnp.float32),
        "wq_t":      jax.random.normal(ks[3], (hidden_dim, hidden_dim), jnp.float32) * 0.1,
        "bq":        jax.random.normal(ks[4], (1, hidden_dim), jnp.float32) * 0.1,
        "query":     jax.random.normal(ks[5], (1, hidden_dim), jnp.float32),
    }


if __name__ == "__main__":
    B, N, L = 2, 3, 8          # batch, news-per-user (*), signal_length
    VOCAB, D_EMB, HIDDEN = 50, 32, 32

    root = jax.random.PRNGKey(0)
    k_tok, k_par = jax.random.split(root)
    params = make_params(k_par, VOCAB, D_EMB, HIDDEN)
    news_batch = jax.random.randint(k_tok, (B, N, L), 0, VOCAB, dtype=jnp.int32)

    ref_emb, ref_repr = reference_forward(news_batch, params)

    # Primary path: fused in-kernel embedding gather (vocab fits in VMEM).
    news_embedding, news_repr = jax.block_until_ready(
        cnn_encoder_forward(news_batch, params))
    assert news_embedding.shape == (B, N, L, 1, HIDDEN)
    assert news_repr.shape == (B, N, HIDDEN)
    # Tolerances cover the intentional bf16 quantization of the MXU operands.
    assert jnp.allclose(news_embedding, ref_emb, atol=3e-2, rtol=3e-2)
    assert jnp.allclose(news_repr, ref_repr, atol=3e-2, rtol=3e-2)

    # Fallback path (large-vocab configs): XLA gather + K-fused conv in kernel.
    emb_fb, repr_fb = jax.block_until_ready(
        cnn_encoder_forward(news_batch, params, fused_gather_max_vocab=0))
    assert jnp.allclose(emb_fb, ref_emb, atol=3e-2, rtol=3e-2)
    assert jnp.allclose(repr_fb, ref_repr, atol=3e-2, rtol=3e-2)

    print("KERNEL_OK")
</pallas_src>

<mosaic_0001>
module attributes {stable_mosaic.version = 11 : i64} {
  func.func @cnn_encoder_kernel_fused(%arg0: i32, %arg1: memref<64x1xi32, #tpu.memory_space<vmem>>, %arg2: memref<384x32xbf16, #tpu.memory_space<vmem>>, %arg3: memref<8x32xf32, #tpu.memory_space<vmem>>, %arg4: memref<32x32xbf16, #tpu.memory_space<vmem>>, %arg5: memref<8x64xf32, #tpu.memory_space<vmem>>, %arg6: memref<64x32xf32, #tpu.memory_space<vmem>>, %arg7: memref<8x32xf32, #tpu.memory_space<vmem>>) attributes {dimension_semantics = [#tpu.dimension_semantics<parallel>], iteration_bounds = array<i64: 1>, scalar_prefetch = 0 : i64, scratch_operands = 0 : i64, tpu.core_type = #tpu.core_type<tc>, window_params = [{transform_indices = @transform_0, window_bounds = array<i64: 64, 1>}, {pipeline_mode = #tpu.pipeline_mode<synchronous>, transform_indices = @transform_1, window_bounds = array<i64: 384, 32>}, {pipeline_mode = #tpu.pipeline_mode<synchronous>, transform_indices = @transform_2, window_bounds = array<i64: 8, 32>}, {pipeline_mode = #tpu.pipeline_mode<synchronous>, transform_indices = @transform_3, window_bounds = array<i64: 32, 32>}, {pipeline_mode = #tpu.pipeline_mode<synchronous>, transform_indices = @transform_4, window_bounds = array<i64: 8, 64>}, {transform_indices = @transform_5, window_bounds = array<i64: 64, 32>}, {transform_indices = @transform_6, window_bounds = array<i64: 8, 32>}]} {
    %c0 = arith.constant 0 : index
    %c0_0 = arith.constant 0 : index
    %0 = vector.load %arg1[%c0, %c0_0] : memref<64x1xi32, #tpu.memory_space<vmem>>, vector<64x1xi32>
    %1 = tpu.iota {dimensions = array<i32: 0>} : vector<64x1xi32>
    %c8_i32 = arith.constant 8 : i32
    %c0_i32 = arith.constant 0 : i32
    %2 = arith.cmpi eq, %c8_i32, %c0_i32 : i32
    %c1_i32 = arith.constant 1 : i32
    %3 = arith.select %2, %c1_i32, %c8_i32 : i32
    %4 = vector.broadcast %3 : i32 to vector<64x1xi32>
    %5 = arith.remsi %1, %4 : vector<64x1xi32>
    %c0_i32_1 = arith.constant 0 : i32
    %6 = vector.broadcast %c0_i32_1 : i32 to vector<64x1xi32>
    %7 = arith.cmpi ne, %5, %6 : vector<64x1xi32>
    %c0_i32_2 = arith.constant 0 : i32
    %8 = vector.broadcast %c0_i32_2 : i32 to vector<64x1xi32>
    %9 = arith.cmpi slt, %5, %8 : vector<64x1xi32>
    %c0_i32_3 = arith.constant 0 : i32
    %10 = arith.cmpi slt, %3, %c0_i32_3 : i32
    %11 = vector.broadcast %10 : i1 to vector<64x1xi1>
    %12 = vector.broadcast %11 : vector<64x1xi1> to vector<64x1xi1>
    %13 = arith.xori %9, %12 : vector<64x1xi1>
    %14 = arith.andi %13, %7 : vector<64x1xi1>
    %15 = vector.broadcast %3 : i32 to vector<64x1xi32>
    %16 = arith.addi %5, %15 : vector<64x1xi32>
    %17 = arith.select %14, %16, %5 : vector<64x1xi1>, vector<64x1xi32>
    %c0_i32_4 = arith.constant 0 : i32
    %18 = vector.broadcast %c0_i32_4 : i32 to vector<64x1xi32>
    %19 = arith.cmpi eq, %17, %18 : vector<64x1xi32>
    %20 = vector.extract_strided_slice %0 {offsets = [63, 0], sizes = [1, 1], strides = [1, 1]} : vector<64x1xi32> to vector<1x1xi32>
    %21 = vector.extract_strided_slice %0 {offsets = [0, 0], sizes = [63, 1], strides = [1, 1]} : vector<64x1xi32> to vector<63x1xi32>
    %22 = tpu.concatenate %20, %21 in 0 : vector<1x1xi32>, vector<63x1xi32> -> vector<64x1xi32>
    %c127_i32 = arith.constant 127 : i32
    %23 = vector.broadcast %c127_i32 : i32 to vector<64x1xi32>
    %24 = arith.select %19, %23, %22 : vector<64x1xi1>, vector<64x1xi32>
    %c8_i32_5 = arith.constant 8 : i32
    %c0_i32_6 = arith.constant 0 : i32
    %25 = arith.cmpi eq, %c8_i32_5, %c0_i32_6 : i32
    %c1_i32_7 = arith.constant 1 : i32
    %26 = arith.select %25, %c1_i32_7, %c8_i32_5 : i32
    %27 = vector.broadcast %26 : i32 to vector<64x1xi32>
    %28 = arith.remsi %1, %27 : vector<64x1xi32>
    %c0_i32_8 = arith.constant 0 : i32
    %29 = vector.broadcast %c0_i32_8 : i32 to vector<64x1xi32>
    %30 = arith.cmpi ne, %28, %29 : vector<64x1xi32>
    %c0_i32_9 = arith.constant 0 : i32
    %31 = vector.broadcast %c0_i32_9 : i32 to vector<64x1xi32>
    %32 = arith.cmpi slt, %28, %31 : vector<64x1xi32>
    %c0_i32_10 = arith.constant 0 : i32
    %33 = arith.cmpi slt, %26, %c0_i32_10 : i32
    %34 = vector.broadcast %33 : i1 to vector<64x1xi1>
    %35 = vector.broadcast %34 : vector<64x1xi1> to vector<64x1xi1>
    %36 = arith.xori %32, %35 : vector<64x1xi1>
    %37 = arith.andi %36, %30 : vector<64x1xi1>
    %38 = vector.broadcast %26 : i32 to vector<64x1xi32>
    %39 = arith.addi %28, %38 : vector<64x1xi32>
    %40 = arith.select %37, %39, %28 : vector<64x1xi1>, vector<64x1xi32>
    %c7_i32 = arith.constant 7 : i32
    %41 = vector.broadcast %c7_i32 : i32 to vector<64x1xi32>
    %42 = arith.cmpi eq, %40, %41 : vector<64x1xi32>
    %43 = vector.extract_strided_slice %0 {offsets = [1, 0], sizes = [63, 1], strides = [1, 1]} : vector<64x1xi32> to vector<63x1xi32>
    %44 = vector.extract_strided_slice %0 {offsets = [0, 0], sizes = [1, 1], strides = [1, 1]} : vector<64x1xi32> to vector<1x1xi32>
    %45 = tpu.concatenate %43, %44 in 0 : vector<63x1xi32>, vector<1x1xi32> -> vector<64x1xi32>
    %c127_i32_11 = arith.constant 127 : i32
    %46 = vector.broadcast %c127_i32_11 : i32 to vector<64x1xi32>
    %47 = arith.select %42, %46, %45 : vector<64x1xi1>, vector<64x1xi32>
    %48 = tpu.iota {dimensions = array<i32: 1>} : vector<64x128xi32>
    %49 = vector.broadcast %24 : vector<64x1xi32> to vector<64x128xi32>
    %50 = arith.cmpi eq, %49, %48 : vector<64x128xi32>
    %cst = arith.constant 1.000000e+00 : f32
    %cst_12 = arith.constant 0.000000e+00 : f32
    %51 = vector.broadcast %cst : f32 to vector<64x128xf32>
    %52 = vector.broadcast %cst_12 : f32 to vector<64x128xf32>
    %53 = arith.select %50, %51, %52 : vector<64x128xi1>, vector<64x128xf32>
    %54 = arith.truncf %53 : vector<64x128xf32> to vector<64x128xbf16>
    %55 = vector.broadcast %0 : vector<64x1xi32> to vector<64x128xi32>
    %56 = arith.cmpi eq, %55, %48 : vector<64x128xi32>
    %cst_13 = arith.constant 1.000000e+00 : f32
    %cst_14 = arith.constant 0.000000e+00 : f32
    %57 = vector.broadcast %cst_13 : f32 to vector<64x128xf32>
    %58 = vector.broadcast %cst_14 : f32 to vector<64x128xf32>
    %59 = arith.select %56, %57, %58 : vector<64x128xi1>, vector<64x128xf32>
    %60 = arith.truncf %59 : vector<64x128xf32> to vector<64x128xbf16>
    %61 = vector.broadcast %47 : vector<64x1xi32> to vector<64x128xi32>
    %62 = arith.cmpi eq, %61, %48 : vector<64x128xi32>
    %cst_15 = arith.constant 1.000000e+00 : f32
    %cst_16 = arith.constant 0.000000e+00 : f32
    %63 = vector.broadcast %cst_15 : f32 to vector<64x128xf32>
    %64 = vector.broadcast %cst_16 : f32 to vector<64x128xf32>
    %65 = arith.select %62, %63, %64 : vector<64x128xi1>, vector<64x128xf32>
    %66 = arith.truncf %65 : vector<64x128xf32> to vector<64x128xbf16>
    %67 = tpu.concatenate %54, %60, %66 in 1 : vector<64x128xbf16>, vector<64x128xbf16>, vector<64x128xbf16> -> vector<64x384xbf16>
    %c0_17 = arith.constant 0 : index
    %c0_18 = arith.constant 0 : index
    %68 = vector.load %arg2[%c0_17, %c0_18] : memref<384x32xbf16, #tpu.memory_space<vmem>>, vector<384x32xbf16>
    %cst_19 = arith.constant dense<0.000000e+00> : vector<64x32xf32>
    %69 = tpu.matmul %67, %68, %cst_19 {dimension_numbers = #tpu.dot_dimension_numbers<[1], [0], [0], [1], [0, 0, 1, 1], [], []>} : vector<64x384xbf16>, vector<384x32xbf16>, vector<64x32xf32> -> vector<64x32xf32>
    %c0_20 = arith.constant 0 : index
    %c0_21 = arith.constant 0 : index
    %70 = vector.load %arg3[%c0_20, %c0_21] : memref<8x32xf32, #tpu.memory_space<vmem>>, vector<1x32xf32>
    %c1 = arith.constant 1 : index
    %c0_22 = arith.constant 0 : index
    %71 = vector.load %arg3[%c1, %c0_22] : memref<8x32xf32, #tpu.memory_space<vmem>>, vector<1x32xf32>
    %c2 = arith.constant 2 : index
    %c0_23 = arith.constant 0 : index
    %72 = vector.load %arg3[%c2, %c0_23] : memref<8x32xf32, #tpu.memory_space<vmem>>, vector<1x32xf32>
    %c3 = arith.constant 3 : index
    %c0_24 = arith.constant 0 : index
    %73 = vector.load %arg3[%c3, %c0_24] : memref<8x32xf32, #tpu.memory_space<vmem>>, vector<1x32xf32>
    %c4 = arith.constant 4 : index
    %c0_25 = arith.constant 0 : index
    %74 = vector.load %arg3[%c4, %c0_25] : memref<8x32xf32, #tpu.memory_space<vmem>>, vector<1x32xf32>
    %c5 = arith.constant 5 : index
    %c0_26 = arith.constant 0 : index
    %75 = vector.load %arg3[%c5, %c0_26] : memref<8x32xf32, #tpu.memory_space<vmem>>, vector<1x1xf32>
    %76 = vector.broadcast %70 : vector<1x32xf32> to vector<64x32xf32>
    %77 = arith.addf %69, %76 : vector<64x32xf32>
    %cst_27 = arith.constant dense<0.000000e+00> : vector<64xf32>
    %78 = vector.multi_reduction <add>, %77, %cst_27 [1] : vector<64x32xf32> to vector<64xf32>
    %79 = vector.shape_cast %78 : vector<64xf32> to vector<64x1xf32>
    %cst_28 = arith.constant 3.200000e+01 : f32
    %80 = vector.broadcast %cst_28 : f32 to vector<64x1xf32>
    %81 = arith.divf %79, %80 : vector<64x1xf32>
    %82 = vector.broadcast %81 : vector<64x1xf32> to vector<64x32xf32>
    %83 = arith.subf %77, %82 : vector<64x32xf32>
    %84 = vector.broadcast %81 : vector<64x1xf32> to vector<64x32xf32>
    %85 = arith.subf %77, %84 : vector<64x32xf32>
    %86 = arith.mulf %83, %85 : vector<64x32xf32>
    %cst_29 = arith.constant dense<0.000000e+00> : vector<64xf32>
    %87 = vector.multi_reduction <add>, %86, %cst_29 [1] : vector<64x32xf32> to vector<64xf32>
    %88 = vector.shape_cast %87 : vector<64xf32> to vector<64x1xf32>
    %cst_30 = arith.constant 3.200000e+01 : f32
    %89 = vector.broadcast %cst_30 : f32 to vector<64x1xf32>
    %90 = arith.divf %88, %89 : vector<64x1xf32>
    %91 = vector.broadcast %81 : vector<64x1xf32> to vector<64x32xf32>
    %92 = arith.subf %77, %91 : vector<64x32xf32>
    %cst_31 = arith.constant 9.99999974E-6 : f32
    %93 = vector.broadcast %cst_31 : f32 to vector<64x1xf32>
    %94 = arith.addf %90, %93 : vector<64x1xf32>
    %95 = math.rsqrt %94 : vector<64x1xf32>
    %96 = vector.broadcast %95 : vector<64x1xf32> to vector<64x32xf32>
    %97 = arith.mulf %92, %96 : vector<64x32xf32>
    %98 = vector.broadcast %71 : vector<1x32xf32> to vector<64x32xf32>
    %99 = arith.mulf %97, %98 : vector<64x32xf32>
    %100 = vector.broadcast %72 : vector<1x32xf32> to vector<64x32xf32>
    %101 = arith.addf %99, %100 : vector<64x32xf32>
    %cst_32 = arith.constant 0.000000e+00 : f32
    %102 = vector.broadcast %cst_32 : f32 to vector<64x32xf32>
    %103 = arith.maximumf %101, %102 : vector<64x32xf32>
    %104 = arith.truncf %103 : vector<64x32xf32> to vector<64x32xbf16>
    %c0_33 = arith.constant 0 : index
    %c0_34 = arith.constant 0 : index
    %105 = vector.load %arg4[%c0_33, %c0_34] : memref<32x32xbf16, #tpu.memory_space<vmem>>, vector<32x32xbf16>
    %cst_35 = arith.constant dense<0.000000e+00> : vector<64x32xf32>
    %106 = tpu.matmul %104, %105, %cst_35 {dimension_numbers = #tpu.dot_dimension_numbers<[1], [0], [0], [1], [0, 0, 1, 1], [], []>} : vector<64x32xbf16>, vector<32x32xbf16>, vector<64x32xf32> -> vector<64x32xf32>
    %107 = vector.broadcast %73 : vector<1x32xf32> to vector<64x32xf32>
    %108 = arith.addf %106, %107 : vector<64x32xf32>
    %109 = math.tanh %108 : vector<64x32xf32>
    %110 = vector.broadcast %74 : vector<1x32xf32> to vector<64x32xf32>
    %111 = arith.mulf %109, %110 : vector<64x32xf32>
    %cst_36 = arith.constant dense<0.000000e+00> : vector<64xf32>
    %112 = vector.multi_reduction <add>, %111, %cst_36 [1] : vector<64x32xf32> to vector<64xf32>
    %113 = vector.shape_cast %112 : vector<64xf32> to vector<64x1xf32>
    %cst_37 = arith.constant 0.176776692 : f32
    %114 = vector.broadcast %cst_37 : f32 to vector<64x1xf32>
    %115 = arith.mulf %113, %114 : vector<64x1xf32>
    %116 = vector.broadcast %75 : vector<1x1xf32> to vector<64x1xf32>
    %117 = arith.subf %115, %116 : vector<64x1xf32>
    %cst_38 = arith.constant -6.000000e+01 : f32
    %118 = vector.broadcast %cst_38 : f32 to vector<64x1xf32>
    %119 = arith.maximumf %117, %118 : vector<64x1xf32>
    %120 = math.exp %119 : vector<64x1xf32>
    %121 = vector.broadcast %120 : vector<64x1xf32> to vector<64x32xf32>
    %122 = arith.mulf %121, %103 : vector<64x32xf32>
    %123 = tpu.concatenate %122, %120 in 1 : vector<64x32xf32>, vector<64x1xf32> -> vector<64x33xf32>
    %c0_39 = arith.constant 0 : index
    %c0_40 = arith.constant 0 : index
    %124 = vector.load %arg5[%c0_39, %c0_40] : memref<8x64xf32, #tpu.memory_space<vmem>>, vector<8x64xf32>
    %cst_41 = arith.constant dense<0.000000e+00> : vector<8x33xf32>
    %125 = tpu.matmul %124, %123, %cst_41 {dimension_numbers = #tpu.dot_dimension_numbers<[1], [0], [0], [1], [0, 0, 1, 1], [], []>} : vector<8x64xf32>, vector<64x33xf32>, vector<8x33xf32> -> vector<8x33xf32>
    %c0_42 = arith.constant 0 : index
    %c0_43 = arith.constant 0 : index
    %126 = vector.load %arg6[%c0_42, %c0_43] : memref<64x32xf32, #tpu.memory_space<vmem>>, vector<64x32xf32>
    tpu.vector_store %arg6[%c0_42, %c0_43], %103 {strides = array<i32>} : memref<64x32xf32, #tpu.memory_space<vmem>>, vector<64x32xf32>,
    %127 = vector.extract_strided_slice %125 {offsets = [0, 0], sizes = [8, 32], strides = [1, 1]} : vector<8x33xf32> to vector<8x32xf32>
    %128 = vector.extract_strided_slice %125 {offsets = [0, 32], sizes = [8, 1], strides = [1, 1]} : vector<8x33xf32> to vector<8x1xf32>
    %129 = vector.broadcast %128 : vector<8x1xf32> to vector<8x32xf32>
    %130 = arith.divf %127, %129 : vector<8x32xf32>
    %c0_44 = arith.constant 0 : index
    %c0_45 = arith.constant 0 : index
    %131 = vector.load %arg7[%c0_44, %c0_45] : memref<8x32xf32, #tpu.memory_space<vmem>>, vector<8x32xf32>
    tpu.vector_store %arg7[%c0_44, %c0_45], %130 {strides = array<i32>} : memref<8x32xf32, #tpu.memory_space<vmem>>, vector<8x32xf32>,
    return
  }
  func.func @transform_0(%arg0: i32) -> (i32, i32) {
    %c0_i32 = arith.constant 0 : i32
    %c0_i32_0 = arith.constant 0 : i32
    return %arg0, %c0_i32 : i32, i32
  }
  func.func @transform_1(%arg0: i32) -> (i32, i32) {
    %c0_i32 = arith.constant 0 : i32
    %c0_i32_0 = arith.constant 0 : i32
    %c0_i32_1 = arith.constant 0 : i32
    return %c0_i32, %c0_i32_0 : i32, i32
  }
  func.func @transform_2(%arg0: i32) -> (i32, i32) {
    %c0_i32 = arith.constant 0 : i32
    %c0_i32_0 = arith.constant 0 : i32
    %c0_i32_1 = arith.constant 0 : i32
    return %c0_i32, %c0_i32_0 : i32, i32
  }
  func.func @transform_3(%arg0: i32) -> (i32, i32) {
    %c0_i32 = arith.constant 0 : i32
    %c0_i32_0 = arith.constant 0 : i32
    %c0_i32_1 = arith.constant 0 : i32
    return %c0_i32, %c0_i32_0 : i32, i32
  }
  func.func @transform_4(%arg0: i32) -> (i32, i32) {
    %c0_i32 = arith.constant 0 : i32
    %c0_i32_0 = arith.constant 0 : i32
    %c0_i32_1 = arith.constant 0 : i32
    return %c0_i32, %c0_i32_0 : i32, i32
  }
  func.func @transform_5(%arg0: i32) -> (i32, i32) {
    %c0_i32 = arith.constant 0 : i32
    %c0_i32_0 = arith.constant 0 : i32
    return %arg0, %c0_i32 : i32, i32
  }
  func.func @transform_6(%arg0: i32) -> (i32, i32) {
    %c0_i32 = arith.constant 0 : i32
    %c0_i32_0 = arith.constant 0 : i32
    return %arg0, %c0_i32 : i32, i32
  }
}

</mosaic_0001>

<bundles_post_ra>
// kernel: tpu_custom_call.1
= control target key start
LH: loop header
LB: loop body
LE: loop exit
PB: predicated region body
PF: predicated region fallthrough
CT: control target
= control target key end

     0   :  { %12 = vsyncpa [#allocation3], 0  ;;  %s2254_s0 = inlined_call_operand.hbm [shape: s32[64,1], index: 0, kind: input, shape index: {}]   ;;  %s2255_s1 = inlined_call_operand.hbm [shape: bf16[384,32], index: 1, kind: input, shape index: {}]   ;;  %s2256_s2 = inlined_call_operand.hbm [shape: f32[8,32], index: 2, kind: input, shape index: {}]   ;;  %s2257_s3 = inlined_call_operand.hbm [shape: bf16[32,32], index: 3, kind: input, shape index: {}]   ;;  %s2258_s4 = inlined_call_operand.hbm [shape: f32[8,64], index: 4, kind: input, shape index: {}]   ;;  %s2259_s5 = inlined_call_operand.hbm [shape: f32[64,32], index: 5, kind: output, shape index: {0}]   ;;  %s2260_s6 = inlined_call_operand.hbm [shape: f32[8,32], index: 6, kind: output, shape index: {1}]  }
   0x1   :  { %13 = vsyncpa [#allocation6], 0 }
   0x2   :  { %14 = vsyncpa [#allocation9], 0 }
   0x3   :  { %15 = vsyncpa [#allocation4], 0 }
   0x4   :  { %16 = vsyncpa [#allocation13], 0  ;;  %s1741_s21 = smov [#allocation5]   ;;  %s1577_s25 = scalar_lea.hbm %s2255_s1, 3072 }
   0x5   :  { %s34_s22 = sshll.u32 %s1741_s21, 4  ;;  %p1578_p0 = scmp.ne.s32.totalorder %s2255_s1, %s1577_s25  ;;  %s35_s22 = int_to_ptr.vmem [resolvable:$true] %s34_s22 }
   0x6   :  { %p1581_p1 = scmp.lt.u32.totalorder %s1577_s25, %s2255_s1 }
   0x8   :  { %p1583_p2 = pnand %p1581_p1, %p1578_p0 }
   0xa   :  { %1586 = shalt.err (!%p1583_p2)
}
   0xb   :  { %s1587_s30 = scalar_lea.vmem %s35_s22, 3072  ;;  %p1592_p4 = scmp.lt.s32.totalorder %s35_s22, %s35_s22 }
   0xc   :  { %p1588_p3 = scmp.ne.s32.totalorder %s35_s22, %s1587_s30  ;;  %p1593_p5 = scmp.lt.s32.totalorder %s1587_s30, %s1587_s30 }
   0xe   :  { %p1594_p6 = por %p1593_p5, %p1592_p4 }
  0x10   :  { %p1595_p7 = pnand %p1594_p6, %p1588_p3 }
  0x12   :  { %1598 = shalt.err (!%p1595_p7)
}
  0x13   :  { %s1742_s7 = smov 64   ;;  %s1743_s8 = smov 4  }
  0x14   :  { %40 = dma.hbm_to_vmem [thread:$0]  %s2255_s1, 3072, %s35_s22, [#allocation6], %s1742_s7, %s1742_s7, %s1743_s8  }
  0x15   :  { %s1744_s11 = smov [#allocation8]   ;;  %s1745_s13 = smov [#allocation2]  }
  0x16   :  { %s56_s12 = sshll.u32 %s1744_s11, 4  ;;  %s22_s14 = sshll.u32 %s1745_s13, 4  ;;  %s57_s12 = int_to_ptr.vmem [resolvable:$true] %s56_s12  ;;  %s23_s14 = int_to_ptr.vmem [resolvable:$true] %s22_s14 }
  0x17   :  { %s1599_s17 = scalar_lea.hbm %s2257_s3, 256 }
  0x18   :  { %p1600_p8 = scmp.ne.s32.totalorder %s2257_s3, %s1599_s17  ;;  %p1603_p9 = scmp.lt.u32.totalorder %s1599_s17, %s2257_s3 }
  0x1a   :  { %p1605_p10 = pnand %p1603_p9, %p1600_p8 }
  0x1c   :  { %1608 = shalt.err (!%p1605_p10)
}
  0x1d   :  { %s1609_s1 = scalar_lea.vmem %s57_s12, 256  ;;  %p1614_p12 = scmp.lt.s32.totalorder %s57_s12, %s57_s12 }
  0x1e   :  { %p1610_p11 = scmp.ne.s32.totalorder %s57_s12, %s1609_s1  ;;  %p1615_p13 = scmp.lt.s32.totalorder %s1609_s1, %s1609_s1 }
  0x20   :  { %p1616_p0 = por %p1615_p13, %p1614_p12 }
  0x22   :  { %p1617_p1 = pnand %p1616_p0, %p1610_p11 }
  0x24   :  { %1620 = shalt.err (!%p1617_p1)
}
  0x25   :  { %62 = dma.hbm_to_vmem [thread:$0]  %s2257_s3, 256, %s57_s12, [#allocation9], %s1742_s7, %s1742_s7, %s1743_s8  }
  0x26   :  { %s1621_s26 = scalar_lea.hbm %s2254_s0, 1024 }
  0x27   :  { %p1622_p2 = scmp.ne.s32.totalorder %s2254_s0, %s1621_s26  ;;  %p1625_p3 = scmp.lt.u32.totalorder %s1621_s26, %s2254_s0 }
  0x29   :  { %p1627_p4 = pnand %p1625_p3, %p1622_p2 }
  0x2b   :  { %1630 = shalt.err (!%p1627_p4)
}
  0x2c   :  { %s1631_s9 = scalar_lea.vmem %s23_s14, 1024  ;;  %p1636_p6 = scmp.lt.s32.totalorder %s23_s14, %s23_s14 }
  0x2d   :  { %p1632_p5 = scmp.ne.s32.totalorder %s23_s14, %s1631_s9  ;;  %p1637_p7 = scmp.lt.s32.totalorder %s1631_s9, %s1631_s9 }
  0x2f   :  { %p1638_p8 = por %p1637_p7, %p1636_p6 }
  0x31   :  { %p1639_p9 = pnand %p1638_p8, %p1632_p5 }
  0x33   :  { %1642 = shalt.err (!%p1639_p9)
}
  0x34   :  { %s1746_s3 = smov 128   ;;  %s1747_s7 = smov 8  }
  0x35   :  { %28 = dma.hbm_to_vmem [thread:$0]  %s2254_s0, 1024, %s23_s14, [#allocation3], %s1746_s3, %s1746_s3, %s1747_s7  }
  0x36   :  { %s1748_s11 = smov [#allocation7]   ;;  %s1749_s13 = smov [#allocation10]  }
  0x37   :  { %s47_s12 = sshll.u32 %s1748_s11, 4  ;;  %s69_s15 = sshll.u32 %s1749_s13, 4  ;;  %s48_s12 = int_to_ptr.vmem [resolvable:$true] %s47_s12  ;;  %s70_s15 = int_to_ptr.vmem [resolvable:$true] %s69_s15 }
  0x38   :  { %s1643_s18 = scalar_lea.hbm %s2256_s2, 128 }
  0x39   :  { %p1644_p10 = scmp.ne.s32.totalorder %s2256_s2, %s1643_s18  ;;  %p1647_p11 = scmp.lt.u32.totalorder %s1643_s18, %s2256_s2 }
  0x3b   :  { %p1649_p12 = pnand %p1647_p11, %p1644_p10 }
  0x3d   :  { %1652 = shalt.err (!%p1649_p12)
}
  0x3e   :  { %s1653_s0 = scalar_lea.vmem %s48_s12, 128  ;;  %p1658_p0 = scmp.lt.s32.totalorder %s48_s12, %s48_s12 }
  0x3f   :  { %p1654_p13 = scmp.ne.s32.totalorder %s48_s12, %s1653_s0  ;;  %p1659_p1 = scmp.lt.s32.totalorder %s1653_s0, %s1653_s0 }
  0x41   :  { %p1660_p2 = por %p1659_p1, %p1658_p0 }
  0x43   :  { %p1661_p3 = pnand %p1660_p2, %p1654_p13 }
  0x45   :  { %1664 = shalt.err (!%p1661_p3)
}
  0x46   :  { %50 = dma.hbm_to_vmem [thread:$0]  %s2256_s2, 128, %s48_s12, [#allocation6]  }
  0x47   :  { %s1665_s25 = scalar_lea.hbm %s2258_s4, 128 }
  0x48   :  { %p1666_p4 = scmp.ne.s32.totalorder %s2258_s4, %s1665_s25  ;;  %p1669_p5 = scmp.lt.u32.totalorder %s1665_s25, %s2258_s4 }
  0x4a   :  { %p1671_p6 = pnand %p1669_p5, %p1666_p4 }
  0x4c   :  { %1674 = shalt.err (!%p1671_p6)
}
  0x4d   :  { %s1675_s30 = scalar_lea.vmem %s70_s15, 128  ;;  %p1680_p8 = scmp.lt.s32.totalorder %s70_s15, %s70_s15 }
  0x4e   :  { %p1676_p7 = scmp.ne.s32.totalorder %s70_s15, %s1675_s30  ;;  %p1681_p9 = scmp.lt.s32.totalorder %s1675_s30, %s1675_s30 }
  0x50   :  { %p1682_p10 = por %p1681_p9, %p1680_p8 }
  0x52   :  { %p1683_p11 = pnand %p1682_p10, %p1676_p7 }
  0x54   :  { %1686 = shalt.err (!%p1683_p11)
}
  0x55   :  { %72 = dma.hbm_to_vmem [thread:$0]  %s2258_s4, 128, %s70_s15, [#allocation9]  }
  0x56   :  { %1731 = dma.done.wait [#allocation3], 1024  }
  0x57   :  { %1732 = vsyncadd [#allocation3], 4294966272 }
  0x58   :  { %1733 = dma.done.wait [#allocation6], 3200  }
  0x59   :  { %1734 = vsyncadd [#allocation6], 4294964096 }
  0x5a   :  { %1735 = dma.done.wait [#allocation9], 384  }
  0x5b   :  { %1736 = vsyncadd [#allocation9], 4294966912  ;;  %v97_v0 = vlaneseq  ;;  %v1750_v1 = vmov 0   ;;  %v1871_v8 = vld [vmem:[#allocation2 + $0x18] sm:$0xff]  ;;  %v1873_v9 = vld [vmem:[#allocation2] sm:$0xff]  ;;  %vm211_vm0 = vcmask 1040384  }
  0x5c   :  { %1479 = vset.pattern.permute.xlu1 %v1750_v1  ;;  %1478 = vset.pattern.permute.xlu0 %v1750_v1  ;;  %v1875_v10 = vld [vmem:[#allocation2 + $0x8] sm:$0xff]  ;;  %v212_v11 = vrot.slane %v1873_v9, 7  ;;  %v1880_v12 = vld [vmem:[#allocation2 + $0x38] sm:$0xff]  ;;  %v1882_v13 = vld [vmem:[#allocation2 + $0x10] sm:$0xff]  ;;  %v217_v17 = vrot.slane %v1871_v8, 7  ;;  %vm243_vm5 = vcmask 1046528  }
  0x5d   :  { %v1858_v2 = vshrl.u32 %v97_v0, 7  ;;  %324 = vperm.xlu1 %1479, %v1871_v8   ;;  %315 = vperm.xlu0 %1478, %v1873_v9   ;;  %v213_v14 = vrot.slane %v1875_v10, 7  ;;  %v210_v15 = vrot.slane %v1880_v12, 7  ;;  %v215_v18 = vrot.slane %v1882_v13, 7  ;;  %v1501_v21 = vld [vmem:[#allocation5 + $0x40] sm:$0xff]   ;;  %v1503_v28 = vld [vmem:[#allocation5 + $0x48] sm:$0xff]  }
  0x5e   :  { %1326 = vmatprep.subr.bf16.mxu0 %v1501_v21  ;;  %v1502_v27 = vld [vmem:[#allocation5] sm:$0xff]   ;;  %v1918_v33 = vld [vmem:[#allocation2 + $0x28] sm:$0xff]  ;;  %v1505_v37 = vld [vmem:[#allocation5 + $0x50] sm:$0xff]   ;;  %v244_v47 = vrot.slane %v1873_v9, 1  ;;  %v245_v48 = vrot.slane %v1875_v10, 1  ;;  %v247_v55 = vrot.slane %v1882_v13, 1 }
  0x5f   :  { %v1861_v3 = vadd.s32 8, %v1858_v2  ;;  %v110_v4 = vand.u32 7, %v1858_v2  ;;  %v1865_v5 = vadd.s32 16, %v1858_v2  ;;  %v1869_v7 = vadd.s32 24, %v1858_v2  ;;  %v1916_v32 = vld [vmem:[#allocation2 + $0x20] sm:$0xff]  ;;  %1327 = vmatpush3.bf16.msra.mxu0 %v1502_v27  ;;  %v1504_v36 = vld [vmem:[#allocation5 + $0x8] sm:$0xff]  }
  0x60   :  { %v226_v22 = vsel %vm211_vm0, %v210_v15, %v212_v11  ;;  %v214_v23 = vsel %vm211_vm0, %v212_v11, %v213_v14  ;;  %v1902_v25 = vadd.s32 32, %v1858_v2  ;;  %v1905_v26 = vadd.s32 40, %v1858_v2  ;;  %1328 = vmatprep.subr.bf16.mxu0 %v1503_v28  ;;  %v1506_v44 = vld [vmem:[#allocation5 + $0x10] sm:$0xff]   ;;  %v1507_v46 = vld [vmem:[#allocation5 + $0x58] sm:$0xff]   ;;  %v1509_v58 = vld [vmem:[#allocation5 + $0x60] sm:$0xff]   ;;  %s1752_s4 = smov 32  }
  0x61   :  { %v117_v6 = vand.u32 7, %v1861_v3  ;;  %vm202_vm1 = vcmp.eq.s32.totalorder %v110_v4, 0  ;;  %v124_v16 = vand.u32 7, %v1865_v5  ;;  %v131_v20 = vand.u32 7, %v1869_v7  ;;  %318 = vperm.xlu0 %1478, %v1875_v10   ;;  %v1508_v56 = vld [vmem:[#allocation5 + $0x18] sm:$0xff]   ;;  %v1510_v63 = vld [vmem:[#allocation5 + $0x20] sm:$0xff]  }
  0x62   :  { %v227_v24 = vsel %vm202_vm1, 127, %v226_v22  ;;  %v216_v31 = vsel %vm211_vm0, %v213_v14, %v215_v18  ;;  %v218_v35 = vsel %vm211_vm0, %v215_v18, %v217_v17  ;;  %v138_v39 = vand.u32 7, %v1902_v25  ;;  %v1976_v1 = vld [vmem:[#allocation2 + $0x30] sm:$0xff]  ;;  %v1511_v11 = vld [vmem:[#allocation5 + $0x68] sm:$0xff]   ;;  %v1520_v27 = vld [vmem:[#allocation5 + $0x98] sm:$0xff]   ;;  %s1757_s8 = smov [#allocation11]  }
  0x63   :  { %vm1891_vm2 = vcmp.eq.s32.totalorder %v117_v6, 0  ;;  %271 = vperm.xlu1 %1479, %v227_v24   ;;  %vm1911_vm3 = vcmp.eq.s32.totalorder %v124_v16, 0  ;;  %vm1922_vm4 = vcmp.eq.s32.totalorder %v131_v20, 0  ;;  %v219_v41 = vrot.slane %v1916_v32, 7  ;;  %1329 = vmatpush3.bf16.msra.mxu0 %v1504_v36  ;;  %v1513_v18 = vld [vmem:[#allocation5 + $0x28] sm:$0xff]   ;;  %v1518_v21 = vld [vmem:[#allocation5 + $0x90] sm:$0xff]  }
  0x64   :  { %v228_v29 = vsel %vm1891_vm2, 127, %v214_v23  ;;  %v229_v38 = vsel %vm1911_vm3, 127, %v216_v31  ;;  %v230_v40 = vsel %vm1922_vm4, 127, %v218_v35  ;;  %v221_v42 = vrot.slane %v1918_v33, 7  ;;  %1330 = vmatprep.subr.bf16.mxu0 %v1505_v37  ;;  %v1516_v23 = vld [vmem:[#allocation5 + $0x30] sm:$0xff]   ;;  %v1517_v28 = vld [vmem:[#allocation5 + $0x78] sm:$0xff]  }
  0x65   :  { %321 = vperm.xlu0 %1478, %v1882_v13   ;;  %v145_v43 = vand.u32 7, %v1905_v26  ;;  %v1937_v45 = vadd.s32 48, %v1858_v2  ;;  %vm1941_vm6 = vcmp.eq.s32.totalorder %v110_v4, 7  ;;  %v1946_v50 = vadd.s32 56, %v1858_v2  ;;  %v1519_v35 = vld [vmem:[#allocation5 + $0x38] sm:$0xff]   ;;  %v1522_v25 = vld [vmem:[#allocation5 + $0xa8] sm:$0xff]  }
  0x66   :  { %vm1950_vm7 = vcmp.eq.s32.totalorder %v138_v39, 0  ;;  %v220_v52 = vsel %vm211_vm0, %v217_v17, %v219_v41  ;;  %v222_v54 = vsel %vm211_vm0, %v219_v41, %v221_v42  ;;  %v249_v57 = vrot.slane %v1871_v8, 1  ;;  %v1512_v8 = vld [vmem:[#allocation5 + $0x80] sm:$0xff]   ;;  %v1524_v49 = vld [vmem:[#allocation5 + $0xb8] sm:$0xff]   ;;  %s1237_s10 = sshll.u32 %s1757_s8, 4  ;;  %s1238_s10 = int_to_ptr.vmem [resolvable:$true] %s1237_s10 }
  0x67   :  { %274 = vperm.xlu1 %1479, %v228_v29   ;;  %vm1957_vm8 = vcmp.eq.s32.totalorder %v145_v43, 0  ;;  %1331 = vmatpush3.bf16.msra.mxu0 %v1506_v44  ;;  %v251_v59 = vrot.slane %v1916_v32, 1  ;;  %v231_v60 = vsel %vm1950_vm7, 127, %v220_v52  ;;  %v246_v62 = vsel %vm243_vm5, %v244_v47, %v245_v48  ;;  %s1687_s11 = scalar_lea.vmem %s1238_s10, 1024  ;;  %p1692_p13 = scmp.lt.s32.totalorder %s1238_s10, %s1238_s10 }
  0x68   :  { %1332 = vmatprep.subr.bf16.mxu0 %v1507_v46  ;;  %v232_v61 = vsel %vm1957_vm8, 127, %v222_v54  ;;  %vm1980_vm9 = vcmp.eq.s32.totalorder %v117_v6, 7  ;;  %v248_v4 = vsel %vm243_vm5, %v245_v48, %v247_v55  ;;  %v260_v10 = vsel %vm1941_vm6, 127, %v246_v62  ;;  %1393 = vmatprep.subr.bf16.mxu1 %v1512_v8  ;;  %p1688_p12 = scmp.ne.s32.totalorder %s1238_s10, %s1687_s11  ;;  %p1693_p0 = scmp.lt.s32.totalorder %s1687_s11, %s1687_s11 }
  0x69   :  { %277 = vperm.xlu0 %1478, %v229_v38   ;;  %vm1989_vm10 = vcmp.eq.s32.totalorder %v124_v16, 7  ;;  %v250_v3 = vsel %vm243_vm5, %v247_v55, %v249_v57  ;;  %vm1996_vm11 = vcmp.eq.s32.totalorder %v131_v20, 7  ;;  %v252_v14 = vsel %vm243_vm5, %v249_v57, %v251_v59  ;;  %1394 = vmatpush3.bf16.msra.mxu1 %v1512_v8  ;;  %v1515_v16 = vld [vmem:[#allocation5 + $0x88] sm:$0xff]   ;;  %v1514_v20 = vld [vmem:[#allocation5 + $0x70] sm:$0xff]   ;;  %v1521_v38 = vld [vmem:[#allocation5 + $0xa0] sm:$0xff]  }
  0x6a   :  { %v261_v5 = vsel %vm1980_vm9, 127, %v248_v4  ;;  %v223_v17 = vrot.slane %v1976_v1, 7  ;;  %v262_v7 = vsel %vm1989_vm10, 127, %v250_v3  ;;  %v263_v19 = vsel %vm1996_vm11, 127, %v252_v14  ;;  %1395 = vmatprep.subr.bf16.mxu1 %v1515_v16  ;;  %p1694_p1 = por %p1693_p0, %p1692_p13 }
  0x6b   :  { %280 = vperm.xlu1 %1479, %v230_v40   ;;  %1333 = vmatpush3.bf16.msra.mxu0 %v1508_v56  ;;  %v152_v22 = vand.u32 7, %v1937_v45  ;;  %v159_v24 = vand.u32 7, %v1946_v50  ;;  %v253_v29 = vrot.slane %v1918_v33, 1  ;;  %v255_v30 = vrot.slane %v1976_v1, 1 }
  0x6c   :  { %1334 = vmatprep.subr.bf16.mxu0 %v1509_v58  ;;  %v224_v34 = vsel %vm211_vm0, %v221_v42, %v223_v17  ;;  %v225_v37 = vsel %vm211_vm0, %v223_v17, %v210_v15  ;;  %vm2036_vm14 = vcmp.eq.s32.totalorder %v138_v39, 7  ;;  %v257_v42 = vrot.slane %v1880_v12, 1  ;;  %p1695_p2 = pnand %p1694_p1, %p1688_p12 }
  0x6d   :  { %327 = vperm.xlu0 %1478, %v1916_v32   ;;  %1396 = vmatpush3.bf16.msra.mxu1 %v1515_v16  ;;  %vm2014_vm12 = vcmp.eq.s32.totalorder %v152_v22, 0  ;;  %vm2021_vm13 = vcmp.eq.s32.totalorder %v159_v24, 0  ;;  %v254_v15 = vsel %vm243_vm5, %v251_v59, %v253_v29  ;;  %vm2046_vm15 = vcmp.eq.s32.totalorder %v145_v43, 7  ;;  %v1523_v43 = vld [vmem:[#allocation5 + $0xb0] sm:$0xff]  }
  0x6e   :  { %1397 = vmatprep.subr.bf16.mxu1 %v1518_v21  ;;  %v234_v40 = vsel %vm2021_vm13, 127, %v225_v37  ;;  %v256_v45 = vsel %vm243_vm5, %v253_v29, %v255_v30  ;;  %v264_v32 = vsel %vm2036_vm14, 127, %v254_v15  ;;  %vm241_vm0 = vcmp.eq.s32.totalorder %v152_v22, 7  ;;  %v1265_v29 = vld [vmem:[#allocation7] ss:$0 sm:$0xff] }
  0x6f   :  { %330 = vperm.xlu1 %1479, %v1918_v33   ;;  %1335 = vmatpush3.bf16.msra.mxu0 %v1510_v63  ;;  %v233_v33 = vsel %vm2014_vm12, 127, %v224_v34  ;;  %v258_v26 = vsel %vm243_vm5, %v255_v30, %v257_v42  ;;  %vm242_vm1 = vcmp.eq.s32.totalorder %v159_v24, 7  ;;  %v259_v39 = vsel %vm243_vm5, %v257_v42, %v244_v47 }
  0x70   :  { %1336 = vmatprep.subr.bf16.mxu0 %v1511_v11  ;;  %v266_v46 = vsel %vm241_vm0, 127, %v258_v26  ;;  %v267_v48 = vsel %vm242_vm1, 127, %v259_v39  ;;  %v2060_v9 = vand.u32 127, %v97_v0  ;;  %v1751_v53 = vmov 1.0|1.0  }
  0x71   :  { %283 = vperm.xlu0 %1478, %v231_v60   ;;  %1398 = vmatpush3.bf16.msra.mxu1 %v1518_v21 }
  0x72   :  { %1399 = vmatprep.subr.bf16.mxu1 %v1520_v27 }
  0x73   :  { %286 = vperm.xlu1 %1479, %v232_v61   ;;  %1337 = vmatpush3.bf16.msra.mxu0 %v1513_v18 }
  0x74   :  { %1338 = vmatprep.subr.bf16.mxu0 %v1514_v20 }
  0x75   :  { %359 = vperm.xlu0 %1478, %v260_v10   ;;  %1400 = vmatpush3.bf16.msra.mxu1 %v1520_v27 }
  0x76   :  { %1401 = vmatprep.subr.bf16.mxu1 %v1521_v38 }
  0x77   :  { %362 = vperm.xlu1 %1479, %v261_v5   ;;  %1339 = vmatpush3.bf16.msra.mxu0 %v1516_v23 }
  0x78   :  { %1340 = vmatprep.subr.bf16.mxu0 %v1517_v28 }
  0x79   :  { %365 = vperm.xlu0 %1478, %v262_v7   ;;  %1402 = vmatpush3.bf16.msra.mxu1 %v1521_v38 }
  0x7a   :  { %1403 = vmatprep.subr.bf16.mxu1 %v1522_v25 }
  0x7b   :  { %368 = vperm.xlu1 %1479, %v263_v19   ;;  %1341 = vmatpush3.bf16.msra.mxu0 %v1519_v35 }
  0x7d   :  { %333 = vperm.xlu0 %1478, %v1976_v1   ;;  %1404 = vmatpush3.bf16.msra.mxu1 %v1522_v25 }
  0x7e   :  { %1405 = vmatprep.subr.bf16.mxu1 %v1523_v43 }
  0x7f   :  { %336 = vperm.xlu1 %1479, %v1880_v12   ;;  %v265_v12 = vsel %vm2046_vm15, 127, %v256_v45 }
  0x81   :  { %289 = vperm.xlu0 %1478, %v233_v33   ;;  %1406 = vmatpush3.bf16.msra.mxu1 %v1523_v43 }
  0x82   :  { %1407 = vmatprep.subr.bf16.mxu1 %v1524_v49 }
  0x83   :  { %292 = vperm.xlu1 %1479, %v234_v40  }
  0x85   :  { %371 = vperm.xlu0 %1478, %v264_v32   ;;  %1408 = vmatpush3.bf16.msra.mxu1 %v1524_v49 }
  0x87   :  { %374 = vperm.xlu1 %1479, %v265_v12  }
  0x89   :  { %377 = vperm.xlu0 %1478, %v266_v46  }
  0x8b   :  { %380 = vperm.xlu1 %1479, %v267_v48  }
  0xdc   :  { %v325_v50 = vpop.permute.xlu1 %324  ;;  %v316_v51 = vpop.permute.xlu0 %315 }
  0xdd   :  { %vm338_vm2 = vcmp.eq.s32.totalorder %v316_v51, %v2060_v9  ;;  %vm341_vm5 = vcmp.eq.s32.totalorder %v325_v50, %v2060_v9 }
  0xe0   :  { %v319_v47 = vpop.permute.xlu0 %318 }
  0xe1   :  { %vm339_vm3 = vcmp.eq.s32.totalorder %v319_v47, %v2060_v9 }
  0xe2   :  { %v272_v52 = vpop.permute.xlu1 %271  ;;  %vm1290_vm4 = vmpackc.low %vm339_vm3, %vm338_vm2 }
  0xe3   :  { %1291 = vmatprep.mubr.msk.bf16.mxu0 %vm1290_vm4, %v1751_v53  ;;  %vm294_vm7 = vcmp.eq.s32.totalorder %v272_v52, %v2060_v9 }
  0xe4   :  { %v322_v54 = vpop.permute.xlu0 %321 }
  0xe5   :  { %vm340_vm6 = vcmp.eq.s32.totalorder %v322_v54, %v2060_v9 }
  0xe6   :  { %v275_v55 = vpop.permute.xlu1 %274  ;;  %vm1294_vm8 = vmpackc.low %vm341_vm5, %vm340_vm6 }
  0xe7   :  { %vm295_vm9 = vcmp.eq.s32.totalorder %v275_v55, %v2060_v9 }
  0xe8   :  { %vm1292_vm10 = vmpackc.low %vm295_vm9, %vm294_vm7  ;;  %v278_v0 = vpop.permute.xlu0 %277 }
  0xe9   :  { %1293 = vmatmul.mubr.msk.bf16.vlgmr.msra.gmra.mrb[0].mxu0 %vm1292_vm10, %v1751_v53  ;;  %vm296_vm11 = vcmp.eq.s32.totalorder %v278_v0, %v2060_v9 }
  0xea   :  { %1295 = vmatprep.mubr.msk.bf16.mxu0 %vm1294_vm8, %v1751_v53  ;;  %v281_v56 = vpop.permute.xlu1 %280 }
  0xeb   :  { %vm297_vm12 = vcmp.eq.s32.totalorder %v281_v56, %v2060_v9 }
  0xec   :  { %v328_v57 = vpop.permute.xlu0 %327  ;;  %vm1296_vm14 = vmpackc.low %vm297_vm12, %vm296_vm11 }
  0xed   :  { %vm342_vm13 = vcmp.eq.s32.totalorder %v328_v57, %v2060_v9 }
  0xee   :  { %v331_v58 = vpop.permute.xlu1 %330 }
  0xef   :  { %vm343_vm15 = vcmp.eq.s32.totalorder %v331_v58, %v2060_v9 }
  0xf0   :  { %vm1298_vm0 = vmpackc.low %vm343_vm15, %vm342_vm13  ;;  %v284_v59 = vpop.permute.xlu0 %283 }
  0xf1   :  { %1297 = vmatmul.mubr.msk.bf16.gmra.mrb[4].mxu0 %vm1296_vm14, %v1751_v53  ;;  %vm298_vm1 = vcmp.eq.s32.totalorder %v284_v59, %v2060_v9 }
  0xf2   :  { %1299 = vmatprep.mubr.msk.bf16.mxu0 %vm1298_vm0, %v1751_v53  ;;  %v287_v60 = vpop.permute.xlu1 %286 }
  0xf3   :  { %vm299_vm2 = vcmp.eq.s32.totalorder %v287_v60, %v2060_v9 }
  0xf4   :  { %v360_v61 = vpop.permute.xlu0 %359  ;;  %vm1300_vm4 = vmpackc.low %vm299_vm2, %vm298_vm1 }
  0xf5   :  { %vm382_vm3 = vcmp.eq.s32.totalorder %v360_v61, %v2060_v9 }
  0xf6   :  { %v363_v62 = vpop.permute.xlu1 %362 }
  0xf7   :  { %vm383_vm5 = vcmp.eq.s32.totalorder %v363_v62, %v2060_v9 }
  0xf8   :  { %vm1306_vm6 = vmpackc.low %vm383_vm5, %vm382_vm3  ;;  %v366_v63 = vpop.permute.xlu0 %365 }
  0xf9   :  { %1301 = vmatmul.mubr.msk.bf16.gmra.mrb[8].mxu0 %vm1300_vm4, %v1751_v53  ;;  %1409 = vmatprep.mubr.msk.bf16.mxu1 %vm1306_vm6, %v1751_v53  ;;  %vm384_vm7 = vcmp.eq.s32.totalorder %v366_v63, %v2060_v9  ;;  %vm734_vm6 = vcmask 261120  }
  0xfa   :  { %v369_v1 = vpop.permute.xlu1 %368 }
  0xfb   :  { %vm385_vm8 = vcmp.eq.s32.totalorder %v369_v1, %v2060_v9 }
  0xfc   :  { %vm1308_vm9 = vmpackc.low %vm385_vm8, %vm384_vm7  ;;  %v334_v2 = vpop.permute.xlu0 %333  ;;  %vm1754_vm7 = vmmov 0   ;;  %vm1142_vm8 = vcmask 523264  }
  0xfd   :  { %1410 = vmatmul.mubr.msk.bf16.vlgmr.msra.gmra.mrb[0].mxu1 %vm1308_vm9, %v1751_v53  ;;  %vm344_vm10 = vcmp.eq.s32.totalorder %v334_v2, %v2060_v9 }
  0xfe   :  { %v337_v4 = vpop.permute.xlu1 %336 }
  0xff   :  { %vm345_vm11 = vcmp.eq.s32.totalorder %v337_v4, %v2060_v9 }
 0x100   :  { %vm1302_vm12 = vmpackc.low %vm345_vm11, %vm344_vm10  ;;  %v290_v8 = vpop.permute.xlu0 %289 }
 0x101   :  { %1303 = vmatprep.mubr.msk.bf16.mxu0 %vm1302_vm12, %v1751_v53  ;;  %vm300_vm13 = vcmp.eq.s32.totalorder %v290_v8, %v2060_v9 }
 0x102   :  { %v293_v10 = vpop.permute.xlu1 %292 }
 0x103   :  { %vm301_vm14 = vcmp.eq.s32.totalorder %v293_v10, %v2060_v9 }
 0x104   :  { %vm1304_vm15 = vmpackc.low %vm301_vm14, %vm300_vm13  ;;  %v372_v11 = vpop.permute.xlu0 %371 }
 0x105   :  { %1305 = vmatmul.mubr.msk.bf16.gmra.mrb[12].mxu0 %vm1304_vm15, %v1751_v53  ;;  %vm386_vm0 = vcmp.eq.s32.totalorder %v372_v11, %v2060_v9 }
 0x106   :  { %v375_v13 = vpop.permute.xlu1 %374 }
 0x107   :  { %vm387_vm1 = vcmp.eq.s32.totalorder %v375_v13, %v2060_v9 }
 0x108   :  { %vm1310_vm2 = vmpackc.low %vm387_vm1, %vm386_vm0  ;;  %v378_v3 = vpop.permute.xlu0 %377 }
 0x109   :  { %1413 = vmatprep.mubr.msk.bf16.mxu1 %vm1310_vm2, %v1751_v53  ;;  %vm388_vm3 = vcmp.eq.s32.totalorder %v378_v3, %v2060_v9 }
 0x10a   :  { %v381_v6 = vpop.permute.xlu1 %380 }
 0x10b   :  { %vm389_vm4 = vcmp.eq.s32.totalorder %v381_v6, %v2060_v9 }
 0x10c   :  { %vm1312_vm5 = vmpackc.low %vm389_vm4, %vm388_vm3 }
 0x10d   :  { %1414 = vmatmul.mubr.msk.bf16.gmra.mrb[4].mxu1 %vm1312_vm5, %v1751_v53 }
 0x1bc   :  { %v1342_v14 = vpop.f32.mrb[0].mxu0 }
 0x1bd   :  { %v1343_v5 = vpop.f32.mrb[1].mxu0 }
 0x1be   :  { %v1344_v16 = vadd.f32 %v1343_v5, %v1342_v14  ;;  %v1345_v17 = vpop.f32.mrb[2].mxu0 }
 0x1bf   :  { %v1346_v18 = vpop.f32.mrb[3].mxu0 }
 0x1c0   :  { %v1347_v7 = vadd.f32 %v1346_v18, %v1345_v17  ;;  %v639_v38 = vadd.f32 %v1344_v16, %v1265_v29 }
 0x1c2   :  { %v642_v44 = vadd.f32 %v1347_v7, %v1265_v29 }
 0x1c4   :  { %v1348_v19 = vpop.f32.mrb[4].mxu0 }
 0x1c5   :  { %v1349_v20 = vpop.f32.mrb[5].mxu0 }
 0x1c6   :  { %v1350_v21 = vadd.f32 %v1349_v20, %v1348_v19  ;;  %v1351_v22 = vpop.f32.mrb[6].mxu0 }
 0x1c7   :  { %v1352_v23 = vpop.f32.mrb[7].mxu0 }
 0x1c8   :  { %v1353_v24 = vadd.f32 %v1352_v23, %v1351_v22  ;;  %v647_v35 = vadd.f32 %v1350_v21, %v1265_v29 }
 0x1ca   :  { %v650_v41 = vadd.f32 %v1353_v24, %v1265_v29 }
 0x1cc   :  { %v1354_v27 = vpop.f32.mrb[8].mxu0 }
 0x1cd   :  { %v1355_v28 = vpop.f32.mrb[9].mxu0 }
 0x1ce   :  { %v1356_v30 = vadd.f32 %v1355_v28, %v1354_v27  ;;  %v1357_v31 = vpop.f32.mrb[10].mxu0 }
 0x1cf   :  { %v1358_v34 = vpop.f32.mrb[11].mxu0 }
 0x1d0   :  { %v1359_v36 = vadd.f32 %v1358_v34, %v1357_v31  ;;  %v1411_v37 = vpop.f32.mrb[0].mxu1  ;;  %v655_v53 = vadd.f32 %v1356_v30, %v1265_v29 }
 0x1d1   :  { %v712_v33 = vadd.f32 %v1411_v37, %v647_v35  ;;  %v703_v40 = vpop.f32.mrb[1].mxu1 }
 0x1d2   :  { %v704_v15 = vadd.f32 %v703_v40, %v639_v38  ;;  %v1412_v42 = vpop.f32.mrb[2].mxu1  ;;  %v658_v58 = vadd.f32 %v1359_v36, %v1265_v29 }
 0x1d3   :  { %v715_v45 = vadd.f32 %v1412_v42, %v650_v41  ;;  %v706_v25 = vpop.f32.mrb[3].mxu1  ;;  %v741_v43 = vsel %vm734_vm6, %v712_v33, 0.0 }
 0x1d4   :  { %v707_v32 = vadd.f32 %v706_v25, %v642_v44  ;;  %v735_v12 = vsel %vm734_vm6, %v704_v15, 0.0 }
 0x1d5   :  { %736 = vadd.xlane.f32.xlu0 %v735_v12  ;;  %v744_v9 = vsel %vm734_vm6, %v715_v45, 0.0 }
 0x1d6   :  { %v738_v26 = vsel %vm734_vm6, %v707_v32, 0.0 }
 0x1d7   :  { %739 = vadd.xlane.f32.xlu1 %v738_v26 }
 0x1d8   :  { %v1360_v39 = vpop.f32.mrb[12].mxu0 }
 0x1d9   :  { %742 = vadd.xlane.f32.xlu0 %v741_v43  ;;  %v1361_v46 = vpop.f32.mrb[13].mxu0  ;;  %v1526_v43 = vld [vmem:[#allocation8 + $0x8] sm:$0xff]  }
 0x1da   :  { %v1362_v48 = vadd.f32 %v1361_v46, %v1360_v39  ;;  %v1363_v49 = vpop.f32.mrb[14].mxu0  ;;  %v1525_v39 = vld [vmem:[#allocation8] sm:$0xff]  }
 0x1db   :  { %v1364_v50 = vpop.f32.mrb[15].mxu0  ;;  %1417 = vmatprep.subr.bf16.mxu1 %v1525_v39 }
 0x1dc   :  { %v1365_v51 = vadd.f32 %v1364_v50, %v1363_v49  ;;  %v663_v47 = vadd.f32 %v1362_v48, %v1265_v29  ;;  %1418 = vmatpush3.bf16.msra.mxu1 %v1525_v39 }
 0x1dd   :  { %745 = vadd.xlane.f32.xlu0 %v744_v9  ;;  %1419 = vmatprep.subr.bf16.mxu1 %v1526_v43 }
 0x1de   :  { %v666_v0 = vadd.f32 %v1365_v51, %v1265_v29 }
 0x1e0   :  { %v1415_v52 = vpop.f32.mrb[4].mxu1  ;;  %1420 = vmatpush3.bf16.msra.mxu1 %v1526_v43 }
 0x1e1   :  { %v728_v54 = vadd.f32 %v1415_v52, %v663_v47  ;;  %v719_v55 = vpop.f32.mrb[5].mxu1 }
 0x1e2   :  { %v720_v56 = vadd.f32 %v719_v55, %v655_v53  ;;  %v1416_v57 = vpop.f32.mrb[6].mxu1 }
 0x1e3   :  { %v731_v59 = vadd.f32 %v1416_v57, %v666_v0  ;;  %v722_v60 = vpop.f32.mrb[7].mxu1  ;;  %v753_v1 = vsel %vm734_vm6, %v728_v54, 0.0  ;;  %v1314_v57 = vld [vmem:[#allocation7 + $0x1] ss:$0 sm:$0xff] }
 0x1e4   :  { %v723_v61 = vadd.f32 %v722_v60, %v658_v58  ;;  %v747_v62 = vsel %vm734_vm6, %v720_v56, 0.0 }
 0x1e5   :  { %748 = vadd.xlane.f32.xlu1 %v747_v62  ;;  %v756_v2 = vsel %vm734_vm6, %v731_v59, 0.0 }
 0x1e6   :  { %v750_v63 = vsel %vm734_vm6, %v723_v61, 0.0 }
 0x1e7   :  { %751 = vadd.xlane.f32.xlu0 %v750_v63 }
 0x1e9   :  { %754 = vadd.xlane.f32.xlu1 %v753_v1 }
 0x1eb   :  { %757 = vadd.xlane.f32.xlu0 %v756_v2 }
 0x262   :  { %v737_v4 = vpop.xlane.xlu0 %736 }
 0x263   :  { %v760_v8 = vmul.f32 0.03125, %v737_v4 }
 0x264   :  { %v740_v10 = vpop.xlane.xlu1 %739 }
 0x265   :  { %v2106_v11 = vsub.f32 %v704_v15, %v760_v8  ;;  %v761_v13 = vmul.f32 0.03125, %v740_v10 }
 0x266   :  { %v743_v3 = vpop.xlane.xlu0 %742 }
 0x267   :  { %v2108_v6 = vsub.f32 %v707_v32, %v761_v13  ;;  %v762_v14 = vmul.f32 0.03125, %v743_v3  ;;  %v776_v5 = vmul.f32 %v2106_v11, %v2106_v11 }
 0x269   :  { %v2112_v16 = vsub.f32 %v712_v33, %v762_v14  ;;  %v784_v17 = vsel %vm734_vm6, %v776_v5, 0.0  ;;  %v777_v18 = vmul.f32 %v2108_v6, %v2108_v6 }
 0x26a   :  { %v746_v7 = vpop.xlane.xlu0 %745  ;;  %785 = vadd.xlane.f32.xlu1 %v784_v17 }
 0x26b   :  { %v763_v19 = vmul.f32 0.03125, %v746_v7  ;;  %v787_v20 = vsel %vm734_vm6, %v777_v18, 0.0  ;;  %v778_v21 = vmul.f32 %v2112_v16, %v2112_v16 }
 0x26c   :  { %788 = vadd.xlane.f32.xlu0 %v787_v20 }
 0x26d   :  { %v2120_v22 = vsub.f32 %v715_v45, %v763_v19  ;;  %v790_v23 = vsel %vm734_vm6, %v778_v21, 0.0 }
 0x26e   :  { %791 = vadd.xlane.f32.xlu1 %v790_v23 }
 0x26f   :  { %v779_v24 = vmul.f32 %v2120_v22, %v2120_v22 }
 0x271   :  { %v793_v27 = vsel %vm734_vm6, %v779_v24, 0.0 }
 0x272   :  { %794 = vadd.xlane.f32.xlu0 %v793_v27  ;;  %v749_v28 = vpop.xlane.xlu1 %748 }
 0x273   :  { %v764_v29 = vmul.f32 0.03125, %v749_v28 }
 0x274   :  { %v752_v30 = vpop.xlane.xlu0 %751 }
 0x275   :  { %v2126_v31 = vsub.f32 %v720_v56, %v764_v29  ;;  %v765_v34 = vmul.f32 0.03125, %v752_v30 }
 0x276   :  { %v755_v35 = vpop.xlane.xlu1 %754 }
 0x277   :  { %v2128_v36 = vsub.f32 %v723_v61, %v765_v34  ;;  %v766_v37 = vmul.f32 0.03125, %v755_v35  ;;  %v780_v38 = vmul.f32 %v2126_v31, %v2126_v31  ;;  %v1315_v61 = vld [vmem:[#allocation7 + $0x2] ss:$0 sm:$0xff] }
 0x278   :  { %v758_v33 = vpop.xlane.xlu0 %757 }
 0x279   :  { %v2132_v40 = vsub.f32 %v728_v54, %v766_v37  ;;  %v767_v41 = vmul.f32 0.03125, %v758_v33  ;;  %v796_v15 = vsel %vm734_vm6, %v780_v38, 0.0  ;;  %v781_v42 = vmul.f32 %v2128_v36, %v2128_v36 }
 0x27a   :  { %797 = vadd.xlane.f32.xlu1 %v796_v15 }
 0x27b   :  { %v2137_v44 = vsub.f32 %v731_v59, %v767_v41  ;;  %v799_v45 = vsel %vm734_vm6, %v781_v42, 0.0  ;;  %v782_v25 = vmul.f32 %v2132_v40, %v2132_v40 }
 0x27c   :  { %800 = vadd.xlane.f32.xlu0 %v799_v45 }
 0x27d   :  { %v802_v32 = vsel %vm734_vm6, %v782_v25, 0.0  ;;  %v783_v12 = vmul.f32 %v2137_v44, %v2137_v44 }
 0x27e   :  { %803 = vadd.xlane.f32.xlu1 %v802_v32 }
 0x27f   :  { %v805_v26 = vsel %vm734_vm6, %v783_v12, 0.0 }
 0x280   :  { %806 = vadd.xlane.f32.xlu0 %v805_v26 }
 0x2f7   :  { %v786_v46 = vpop.xlane.xlu1 %785 }
 0x2f8   :  { %v808_v48 = vmul.f32 0.03125, %v786_v46 }
 0x2f9   :  { %v789_v49 = vpop.xlane.xlu0 %788 }
 0x2fa   :  { %v816_v50 = vadd.f32 1e-05, %v808_v48  ;;  %v809_v51 = vmul.f32 0.03125, %v789_v49 }
 0x2fb   :  { %v792_v9 = vpop.xlane.xlu1 %791 }
 0x2fc   :  { %1527 = vrsqrt.f32 %v816_v50  ;;  %v817_v47 = vadd.f32 1e-05, %v809_v51  ;;  %v810_v52 = vmul.f32 0.03125, %v792_v9 }
 0x2fe   :  { %1529 = vrsqrt.f32 %v817_v47  ;;  %v818_v53 = vadd.f32 1e-05, %v810_v52  ;;  %v1316_v47 = vld [vmem:[#allocation7 + $0x3] ss:$0 sm:$0xff] }
 0x2ff   :  { %v795_v54 = vpop.xlane.xlu0 %794 }
 0x300   :  { %1531 = vrsqrt.f32 %v818_v53  ;;  %v811_v55 = vmul.f32 0.03125, %v795_v54 }
 0x302   :  { %v819_v0 = vadd.f32 1e-05, %v811_v55 }
 0x304   :  { %1533 = vrsqrt.f32 %v819_v0 }
 0x306   :  { %v1528_v56 = vpop.eup %1527 }
 0x307   :  { %v832_v58 = vmul.f32 %v1528_v56, %v2106_v11  ;;  %v798_v59 = vpop.xlane.xlu1 %797 }
 0x308   :  { %v1530_v60 = vpop.eup %1529  ;;  %v812_v62 = vmul.f32 0.03125, %v798_v59  ;;  %v1323_v59 = vld [vmem:[#allocation7 + $0x4] ss:$0 sm:$0xff] }
 0x309   :  { %v833_v63 = vmul.f32 %v1530_v60, %v2108_v6  ;;  %v801_v1 = vpop.xlane.xlu0 %800  ;;  %v844_v2 = vmul.f32 %v1314_v57, %v832_v58 }
 0x30a   :  { %v1532_v4 = vpop.eup %1531  ;;  %v820_v8 = vadd.f32 1e-05, %v812_v62  ;;  %v813_v10 = vmul.f32 0.03125, %v801_v1 }
 0x30b   :  { %v834_v13 = vmul.f32 %v1532_v4, %v2112_v16  ;;  %v804_v3 = vpop.xlane.xlu1 %803  ;;  %v845_v14 = vmul.f32 %v1314_v57, %v833_v63  ;;  %v856_v5 = vadd.f32 %v1315_v61, %v844_v2 }
 0x30c   :  { %1535 = vrsqrt.f32 %v820_v8  ;;  %v821_v17 = vadd.f32 1e-05, %v813_v10  ;;  %v814_v18 = vmul.f32 0.03125, %v804_v3 }
 0x30d   :  { %v846_v11 = vmul.f32 %v1314_v57, %v834_v13  ;;  %v807_v7 = vpop.xlane.xlu0 %806  ;;  %v857_v19 = vadd.f32 %v1315_v61, %v845_v14  ;;  %v2149_v20 = vmax.f32 %v856_v5, 0.0 }
 0x30e   :  { %v1534_v21 = vpop.eup %1533  ;;  %1537 = vrsqrt.f32 %v821_v17  ;;  %v822_v6 = vadd.f32 1e-05, %v814_v18  ;;  %v815_v23 = vmul.f32 0.03125, %v807_v7 }
 0x30f   :  { %v858_v24 = vadd.f32 %v1315_v61, %v846_v11  ;;  %v835_v27 = vmul.f32 %v1534_v21, %v2120_v22  ;;  %v2152_v28 = vmax.f32 %v857_v19, 0.0  ;;  %1216 = vst.msk [vmem:[#allocation11] sm:$0xff] %vm734_vm6, %v2149_v20 }
 0x310   :  { %1539 = vrsqrt.f32 %v822_v6  ;;  %v823_v16 = vadd.f32 1e-05, %v815_v23 }
 0x311   :  { %v2156_v29 = vmax.f32 %v858_v24, 0.0  ;;  %v847_v30 = vmul.f32 %v1314_v57, %v835_v27  ;;  %v872_v34 = vpack.c.bf16 %v2152_v28, %v2149_v20  ;;  %1217 = vst.msk [vmem:[#allocation11 + $0x8] sm:$0xff] %vm734_vm6, %v2152_v28 }
 0x312   :  { %1541 = vrsqrt.f32 %v823_v16 }
 0x313   :  { %1218 = vst.msk [vmem:[#allocation11 + $0x10] sm:$0xff] %vm734_vm6, %v2156_v29  ;;  %v859_v22 = vadd.f32 %v1315_v61, %v847_v30  ;;  %1421 = vmatprep.mubr.msk.bf16.mxu1 %vm734_vm6, %v872_v34 }
 0x315   :  { %v2165_v35 = vmax.f32 %v859_v22, 0.0 }
 0x316   :  { %v1536_v37 = vpop.eup %1535 }
 0x317   :  { %1219 = vst.msk [vmem:[#allocation11 + $0x18] sm:$0xff] %vm734_vm6, %v2165_v35  ;;  %v836_v38 = vmul.f32 %v1536_v37, %v2126_v31  ;;  %v873_v33 = vpack.c.bf16 %v2165_v35, %v2156_v29 }
 0x318   :  { %v1538_v41 = vpop.eup %1537 }
 0x319   :  { %v837_v15 = vmul.f32 %v1538_v41, %v2128_v36  ;;  %1422 = vmatmul.mubr.msk.bf16.vlgmr.msra.gmra.mrb[8].mxu1 %vm734_vm6, %v873_v33  ;;  %v848_v42 = vmul.f32 %v1314_v57, %v836_v38 }
 0x31a   :  { %v1540_v45 = vpop.eup %1539 }
 0x31b   :  { %v838_v25 = vmul.f32 %v1540_v45, %v2132_v40  ;;  %v849_v32 = vmul.f32 %v1314_v57, %v837_v15  ;;  %v860_v12 = vadd.f32 %v1315_v61, %v848_v42  ;;  %v1324_v42 = vld [vmem:[#allocation7 + $0x5] ss:$0 sm:$0xff] }
 0x31c   :  { %v1542_v26 = vpop.eup %1541 }
 0x31d   :  { %v839_v39 = vmul.f32 %v1542_v26, %v2137_v44  ;;  %v861_v43 = vadd.f32 %v1315_v61, %v849_v32  ;;  %v2176_v46 = vmax.f32 %v860_v12, 0.0  ;;  %v850_v31 = vmul.f32 %v1314_v57, %v838_v25 }
 0x31f   :  { %v2178_v48 = vmax.f32 %v861_v43, 0.0  ;;  %1220 = vst.msk [vmem:[#allocation11 + $0x20] sm:$0xff] %vm734_vm6, %v2176_v46  ;;  %v851_v36 = vmul.f32 %v1314_v57, %v839_v39  ;;  %v862_v49 = vadd.f32 %v1315_v61, %v850_v31 }
 0x321   :  { %v874_v50 = vpack.c.bf16 %v2178_v48, %v2176_v46  ;;  %1221 = vst.msk [vmem:[#allocation11 + $0x28] sm:$0xff] %vm734_vm6, %v2178_v48  ;;  %v863_v40 = vadd.f32 %v1315_v61, %v851_v36  ;;  %v2186_v51 = vmax.f32 %v862_v49, 0.0 }
 0x323   :  { %1425 = vmatprep.mubr.msk.bf16.mxu1 %vm734_vm6, %v874_v50  ;;  %v2189_v44 = vmax.f32 %v863_v40, 0.0  ;;  %1222 = vst.msk [vmem:[#allocation11 + $0x30] sm:$0xff] %vm734_vm6, %v2186_v51 }
 0x325   :  { %v875_v9 = vpack.c.bf16 %v2189_v44, %v2186_v51  ;;  %1223 = vst.msk [vmem:[#allocation11 + $0x38] sm:$0xff] %vm734_vm6, %v2189_v44 }
 0x327   :  { %1426 = vmatmul.mubr.msk.bf16.gmra.mrb[12].mxu1 %vm734_vm6, %v875_v9 }
 0x3ec   :  { %v1423_v52 = vpop.f32.mrb[8].mxu1 }
 0x3ed   :  { %v951_v53 = vadd.f32 %v1423_v52, %v1316_v47  ;;  %v942_v54 = vpop.f32.mrb[9].mxu1 }
 0x3ee   :  { %v943_v55 = vadd.f32 %v1316_v47, %v942_v54  ;;  %v1424_v0 = vpop.f32.mrb[10].mxu1 }
 0x3ef   :  { %1543 = vtanh.f32 %v951_v53  ;;  %v954_v56 = vadd.f32 %v1424_v0, %v1316_v47  ;;  %v945_v57 = vpop.f32.mrb[11].mxu1 }
 0x3f0   :  { %1545 = vtanh.f32 %v943_v55  ;;  %v946_v58 = vadd.f32 %v1316_v47, %v945_v57 }
 0x3f1   :  { %1547 = vtanh.f32 %v954_v56 }
 0x3f2   :  { %1549 = vtanh.f32 %v946_v58 }
 0x3f9   :  { %v1544_v60 = vpop.eup %1543 }
 0x3fa   :  { %v1546_v61 = vpop.eup %1545  ;;  %v1427_v62 = vpop.f32.mrb[12].mxu1  ;;  %v987_v3 = vmul.f32 %v1544_v60, %v1323_v59 }
 0x3fb   :  { %v1548_v63 = vpop.eup %1547  ;;  %v967_v1 = vadd.f32 %v1427_v62, %v1316_v47  ;;  %v958_v2 = vpop.f32.mrb[13].mxu1  ;;  %v985_v4 = vmul.f32 %v1546_v61, %v1323_v59 }
 0x3fc   :  { %v1550_v8 = vpop.eup %1549  ;;  %v959_v10 = vadd.f32 %v1316_v47, %v958_v2  ;;  %v1428_v13 = vpop.f32.mrb[14].mxu1  ;;  %v988_v19 = vmul.f32 %v1548_v63, %v1323_v59  ;;  %v999_v21 = vsel %vm734_vm6, %v987_v3, 0.0 }
 0x3fd   :  { %1551 = vtanh.f32 %v967_v1  ;;  %v970_v14 = vadd.f32 %v1428_v13, %v1316_v47  ;;  %v961_v5 = vpop.f32.mrb[15].mxu1  ;;  %v993_v17 = vsel %vm734_vm6, %v985_v4, 0.0  ;;  %v986_v18 = vmul.f32 %v1550_v8, %v1323_v59 }
 0x3fe   :  { %1553 = vtanh.f32 %v959_v10  ;;  %v962_v11 = vadd.f32 %v1316_v47, %v961_v5  ;;  %994 = vadd.xlane.f32.xlu1 %v993_v17  ;;  %v1002_v6 = vsel %vm734_vm6, %v988_v19, 0.0 }
 0x3ff   :  { %1555 = vtanh.f32 %v970_v14  ;;  %v996_v7 = vsel %vm734_vm6, %v986_v18, 0.0 }
 0x400   :  { %1557 = vtanh.f32 %v962_v11  ;;  %997 = vadd.xlane.f32.xlu0 %v996_v7 }
 0x402   :  { %1000 = vadd.xlane.f32.xlu1 %v999_v21 }
 0x404   :  { %1003 = vadd.xlane.f32.xlu0 %v1002_v6 }
 0x407   :  { %v1552_v23 = vpop.eup %1551 }
 0x408   :  { %v1554_v24 = vpop.eup %1553  ;;  %v991_v37 = vmul.f32 %v1552_v23, %v1323_v59 }
 0x409   :  { %v1556_v27 = vpop.eup %1555  ;;  %v989_v16 = vmul.f32 %v1554_v24, %v1323_v59 }
 0x40a   :  { %v1558_v30 = vpop.eup %1557  ;;  %v992_v33 = vmul.f32 %v1556_v27, %v1323_v59  ;;  %v1011_v41 = vsel %vm734_vm6, %v991_v37, 0.0  ;;  %v1753_v27 = vmov 0.0|0.0  }
 0x40b   :  { %v1005_v34 = vsel %vm734_vm6, %v989_v16, 0.0  ;;  %v990_v22 = vmul.f32 %v1558_v30, %v1323_v59  ;;  %1448 = vmatprep.subr.bf16.mxu0 %v1753_v27 }
 0x40c   :  { %1006 = vadd.xlane.f32.xlu1 %v1005_v34  ;;  %v1014_v15 = vsel %vm734_vm6, %v992_v33, 0.0 }
 0x40d   :  { %v1008_v38 = vsel %vm734_vm6, %v990_v22, 0.0 }
 0x40e   :  { %1009 = vadd.xlane.f32.xlu0 %v1008_v38 }
 0x410   :  { %1012 = vadd.xlane.f32.xlu1 %v1011_v41  ;;  %v1755_v41 = vmov 0.0  }
 0x411   :  { %1445 = vmatprep.mubr.msk.f32.mxu0 %vm1754_vm7, %v1755_v41 }
 0x412   :  { %1015 = vadd.xlane.f32.xlu0 %v1014_v15  ;;  %v1756_v15 = vmov 32  }
 0x48b   :  { %v995_v45 = vpop.xlane.xlu1 %994 }
 0x48c   :  { %v1017_v25 = vmul.f32 0.17677669, %v995_v45 }
 0x48d   :  { %v998_v32 = vpop.xlane.xlu0 %997 }
 0x48e   :  { %v1029_v12 = vsub.f32 %v1017_v25, %v1324_v42  ;;  %v1018_v26 = vmul.f32 0.17677669, %v998_v32 }
 0x48f   :  { %v1001_v39 = vpop.xlane.xlu1 %1000 }
 0x490   :  { %v1037_v43 = vmax.f32 %v1029_v12, -60.0  ;;  %v1030_v31 = vsub.f32 %v1018_v26, %v1324_v42  ;;  %v1019_v36 = vmul.f32 0.17677669, %v1001_v39 }
 0x491   :  { %v1004_v49 = vpop.xlane.xlu0 %1003 }
 0x492   :  { %v1038_v50 = vmax.f32 %v1030_v31, -60.0  ;;  %v1031_v40 = vsub.f32 %v1019_v36, %v1324_v42  ;;  %v1020_v9 = vmul.f32 0.17677669, %v1004_v49  ;;  %v1045_v47 = vmul.f32 1.442695, %v1037_v43 }
 0x494   :  { %v1047_v52 = vmul.f32 1.442695, %v1038_v50  ;;  %v1039_v53 = vmax.f32 %v1031_v40, -60.0  ;;  %v1032_v54 = vsub.f32 %v1020_v9, %v1324_v42 }
 0x496   :  { %1559 = vpow2.f32 %v1047_v52  ;;  %v1049_v55 = vmul.f32 1.442695, %v1039_v53  ;;  %v1040_v0 = vmax.f32 %v1032_v54, -60.0 }
 0x497   :  { %1561 = vpow2.f32 %v1045_v47 }
 0x498   :  { %1563 = vpow2.f32 %v1049_v55  ;;  %v1051_v58 = vmul.f32 1.442695, %v1040_v0 }
 0x499   :  { %v1007_v56 = vpop.xlane.xlu1 %1006 }
 0x49a   :  { %v1021_v57 = vmul.f32 0.17677669, %v1007_v56  ;;  %1565 = vpow2.f32 %v1051_v58 }
 0x49b   :  { %v1010_v59 = vpop.xlane.xlu0 %1009 }
 0x49c   :  { %v1033_v60 = vsub.f32 %v1021_v57, %v1324_v42  ;;  %v1022_v61 = vmul.f32 0.17677669, %v1010_v59 }
 0x49d   :  { %v1013_v62 = vpop.xlane.xlu1 %1012 }
 0x49e   :  { %v1041_v63 = vmax.f32 %v1033_v60, -60.0  ;;  %v1034_v1 = vsub.f32 %v1022_v61, %v1324_v42  ;;  %v1023_v2 = vmul.f32 0.17677669, %v1013_v62 }
 0x49f   :  { %v1016_v4 = vpop.xlane.xlu0 %1015 }
 0x4a0   :  { %v1560_v8 = vpop.eup %1559  ;;  %v1053_v10 = vmul.f32 1.442695, %v1041_v63  ;;  %v1042_v13 = vmax.f32 %v1034_v1, -60.0  ;;  %v1035_v3 = vsub.f32 %v1023_v2, %v1324_v42  ;;  %v1024_v14 = vmul.f32 0.17677669, %v1016_v4 }
 0x4a1   :  { %v1562_v5 = vpop.eup %1561  ;;  %1068 = vperm.xlu0 %1478, %v1560_v8  }
 0x4a2   :  { %v1564_v17 = vpop.eup %1563  ;;  %1567 = vpow2.f32 %v1053_v10  ;;  %v1055_v18 = vmul.f32 1.442695, %v1042_v13  ;;  %v1043_v11 = vmax.f32 %v1035_v3, -60.0  ;;  %v1036_v7 = vsub.f32 %v1024_v14, %v1324_v42  ;;  %v1141_v3 = vld [vmem:[#allocation10] sm:$0xff] }
 0x4a3   :  { %1073 = vperm.xlu1 %1479, %v1564_v17   ;;  %v1480_v19 = vpack.i.bf16 %v1560_v8, %v1562_v5 }
 0x4a4   :  { %1569 = vpow2.f32 %v1055_v18  ;;  %v1057_v21 = vmul.f32 1.442695, %v1043_v11  ;;  %v1044_v6 = vmax.f32 %v1036_v7, -60.0  ;;  %v1566_v24 = vpop.eup %1565 }
 0x4a5   :  { %1481 = vrot.lane.b32.xlu0 %v1480_v19, %s1752_s4  ;;  %v1485_v38 = vpack.i.bf16 %v1566_v24, %v1564_v17 }
 0x4a6   :  { %v1059_v23 = vmul.f32 1.442695, %v1044_v6  ;;  %1571 = vpow2.f32 %v1057_v21 }
 0x4a7   :  { %1063 = vperm.xlu1 %1479, %v1562_v5  }
 0x4a8   :  { %1573 = vpow2.f32 %v1059_v23 }
 0x4ab   :  { %1078 = vperm.xlu1 %1479, %v1566_v24  }
 0x4ac   :  { %v1568_v16 = vpop.eup %1567 }
 0x4ad   :  { %1083 = vperm.xlu0 %1478, %v1568_v16  }
 0x4ae   :  { %v1570_v30 = vpop.eup %1569 }
 0x4af   :  { %1088 = vperm.xlu1 %1479, %v1570_v30   ;;  %v1490_v37 = vpack.i.bf16 %v1570_v30, %v1568_v16 }
 0x4b0   :  { %v1572_v34 = vpop.eup %1571 }
 0x4b2   :  { %v1574_v22 = vpop.eup %1573 }
 0x4b3   :  { %1098 = vperm.xlu0 %1478, %v1574_v22   ;;  %1093 = vperm.xlu1 %1479, %v1572_v34   ;;  %v1495_v33 = vpack.i.bf16 %v1574_v22, %v1572_v34 }
 0x4b7   :  { %1491 = vrot.lane.b32.xlu0 %v1490_v37, %s1752_s4  ;;  %1486 = vrot.lane.b32.xlu1 %v1485_v38, %s1752_s4 }
 0x4b8   :  { %1500 = vset.pattern.permute.xlu0 %v1756_v15 }
 0x4bb   :  { %1496 = vrot.lane.b32.xlu1 %v1495_v33, %s1752_s4 }
 0x520   :  { %v1069_v42 = vpop.permute.xlu0 %1068 }
 0x521   :  { %v1102_v26 = vmul.f32 %v1069_v42, %v2152_v28 }
 0x522   :  { %v1074_v45 = vpop.permute.xlu1 %1073 }
 0x523   :  { %v1103_v53 = vmul.f32 %v1074_v45, %v2156_v29 }
 0x524   :  { %v1482_v25 = vpop.permute.xlu0 %1481 }
 0x525   :  { %v1484_v32 = vunpack.i.h.bf16 %v1482_v25  ;;  %v1483_v39 = vunpack.i.l.bf16 %v1482_v25 }
 0x526   :  { %v1064_v12 = vpop.permute.xlu1 %1063 }
 0x527   :  { %v1101_v43 = vmul.f32 %v1064_v12, %v2149_v20  ;;  %v1134_v31 = vsel %vm734_vm6, %v1102_v26, %v1484_v32 }
 0x529   :  { %v1133_v36 = vsel %vm734_vm6, %v1101_v43, %v1483_v39 }
 0x52a   :  { %v1449_v49 = vpack.c.bf16 %v1134_v31, %v1133_v36  ;;  %v1079_v50 = vpop.permute.xlu1 %1078 }
 0x52b   :  { %v1104_v28 = vmul.f32 %v1079_v50, %v2165_v35 }
 0x52c   :  { %1450 = vmatpush3.bf16.msra.mxu0 %v1449_v49  ;;  %v1084_v40 = vpop.permute.xlu0 %1083 }
 0x52d   :  { %1451 = vmatprep.subr.bf16.mxu0 %v1753_v27  ;;  %v1105_v58 = vmul.f32 %v1084_v40, %v2176_v46 }
 0x52e   :  { %v1089_v9 = vpop.permute.xlu1 %1088 }
 0x52f   :  { %v1106_v59 = vmul.f32 %v1089_v9, %v2178_v48 }
 0x532   :  { %v1099_v47 = vpop.permute.xlu0 %1098  ;;  %v1094_v52 = vpop.permute.xlu1 %1093 }
 0x533   :  { %v1108_v4 = vmul.f32 %v1099_v47, %v2189_v44  ;;  %v1107_v8 = vmul.f32 %v1094_v52, %v2186_v51 }
 0x536   :  { %v1492_v54 = vpop.permute.xlu0 %1491  ;;  %v1487_v55 = vpop.permute.xlu1 %1486 }
 0x537   :  { %v1494_v20 = vunpack.i.h.bf16 %v1492_v54  ;;  %v1493_v0 = vunpack.i.l.bf16 %v1492_v54  ;;  %v1489_v56 = vunpack.i.h.bf16 %v1487_v55  ;;  %v1488_v57 = vunpack.i.l.bf16 %v1487_v55 }
 0x539   :  { %v1136_v60 = vsel %vm734_vm6, %v1104_v28, %v1489_v56  ;;  %v1135_v61 = vsel %vm734_vm6, %v1103_v53, %v1488_v57  ;;  %v1137_v29 = vsel %vm734_vm6, %v1105_v58, %v1493_v0  ;;  %v1138_v35 = vsel %vm734_vm6, %v1106_v59, %v1494_v20 }
 0x53a   :  { %v1452_v62 = vpack.c.bf16 %v1136_v60, %v1135_v61  ;;  %v1497_v63 = vpop.permute.xlu1 %1496  ;;  %v1455_v46 = vpack.c.bf16 %v1138_v35, %v1137_v29 }
 0x53b   :  { %v1499_v1 = vunpack.i.h.bf16 %v1497_v63  ;;  %v1498_v2 = vunpack.i.l.bf16 %v1497_v63 }
 0x53c   :  { %1453 = vmatpush3.bf16.msra.mxu0 %v1452_v62 }
 0x53d   :  { %1454 = vmatprep.subr.bf16.mxu0 %v1753_v27  ;;  %v1140_v48 = vsel %vm734_vm6, %v1108_v4, %v1499_v1  ;;  %v1139_v10 = vsel %vm734_vm6, %v1107_v8, %v1498_v2 }
 0x53e   :  { %v1458_v13 = vpack.c.bf16 %v1140_v48, %v1139_v10 }
 0x540   :  { %1456 = vmatpush3.bf16.msra.mxu0 %v1455_v46 }
 0x541   :  { %1457 = vmatprep.subr.bf16.mxu0 %v1753_v27 }
 0x544   :  { %1459 = vmatpush3.bf16.msra.mxu0 %v1458_v13 }
 0x547   :  { %1446 = vmatmul.mubr.msk.f32.vlgmr.msra.gmra.mrb[16].mxu0 %vm1142_vm8, %v1141_v3 }
 0x61a   :  { %v1212_v14 = vpop.f32.mrb[16].mxu0 }
 0x61b   :  { %1226 = vperm.xlu0 %1500, %v1212_v14   ;;  %v1447_v44 = vpop.f32.mrb[17].mxu0 }
 0x61c   :  { %1698 = shalt.err (!%p1695_p2)
}
 0x61d   :  { %s1699_s15 = scalar_lea.hbm %s2259_s5, 1024 }
 0x61e   :  { %p1700_p3 = scmp.ne.s32.totalorder %s2259_s5, %s1699_s15  ;;  %p1703_p4 = scmp.lt.u32.totalorder %s1699_s15, %s2259_s5 }
 0x620   :  { %p1705_p5 = pnand %p1703_p4, %p1700_p3 }
 0x622   :  { %1708 = shalt.err (!%p1705_p5)
}
 0x623   :  { %1243 = dma.vmem_to_hbm [thread:$0]  %s1238_s10, 1024, %s2259_s5, [#allocation4], %s1746_s3, %s1746_s3, %s1747_s7  }
 0x624   :  { %s1758_s1 = smov [#allocation12]  }
 0x625   :  { %s1250_s0 = sshll.u32 %s1758_s1, 4  ;;  %s1251_s0 = int_to_ptr.vmem [resolvable:$true] %s1250_s0 }
 0x626   :  { %s1709_s14 = scalar_lea.vmem %s1251_s0, 128  ;;  %p1714_p7 = scmp.lt.s32.totalorder %s1251_s0, %s1251_s0 }
 0x627   :  { %p1710_p6 = scmp.ne.s32.totalorder %s1251_s0, %s1709_s14  ;;  %p1715_p8 = scmp.lt.s32.totalorder %s1709_s14, %s1709_s14 }
 0x629   :  { %p1716_p9 = por %p1715_p8, %p1714_p7 }
 0x62b   :  { %p1717_p10 = pnand %p1716_p9, %p1710_p6 }
 0x69a   :  { %v1227_v51 = vpop.permute.xlu0 %1226 }
 0x69b   :  { %1575 = vrcp.f32 %v1227_v51 }
 0x6a5   :  { %v1576_v5 = vpop.eup %1575 }
 0x6a6   :  { %v1230_v17 = vmul.f32 %v1576_v5, %v1212_v14 }
 0x6a8   :  { %1231 = vst.msk [vmem:[#allocation12] sm:$0xff] %vm734_vm6, %v1230_v17 }
 0x6a9   :  { %1720 = shalt.err (!%p1717_p10)
}
 0x6aa   :  { %s1721_s5 = scalar_lea.hbm %s2260_s6, 128 }
 0x6ab   :  { %p1722_p11 = scmp.ne.s32.totalorder %s2260_s6, %s1721_s5  ;;  %p1725_p12 = scmp.lt.u32.totalorder %s1721_s5, %s2260_s6 }
 0x6ad   :  { %p1727_p13 = pnand %p1725_p12, %p1722_p11 }
 0x6af   :  { %1730 = shalt.err (!%p1727_p13)
}
 0x6b0   :  { %1253 = dma.vmem_to_hbm [thread:$0]  %s1251_s0, 128, %s2260_s6, [#allocation13]  }
 0x6b1   :  { %1737 = dma.done.wait [#allocation4], 1024  }
 0x6b2   :  { %1738 = vsyncadd [#allocation4], 4294966272 }
 0x6b3   :  { %1739 = dma.done.wait [#allocation13], 128  }
 0x6b4   :  { %1740 = vsyncadd [#allocation13], 4294967168 }
 0x6b5   :  { %1260 = vsyncpa [#allocation3], 1 }
 0x6b6   :  { %1261 = vsyncpa [#allocation6], 1 }
 0x6b7   :  { %1262 = vsyncpa [#allocation9], 1 }
 0x6b8   :  { %1263 = vsyncpa [#allocation4], 1 }
 0x6b9   :  { %1264 = vsyncpa [#allocation13], 1 }

</bundles_post_ra>
